<compile_context>
chip_gen: v7x
topology: tpu7x:2x2x1
jax: 0.10.0
libtpu: 0.0.40
codegen_flags: <defaults>
</compile_context>

<pallas_src>
import math

import jax
import jax.numpy as jnp
from jax import lax
from jax.experimental import pallas as pl
from jax.experimental.pallas import tpu as pltpu


# ----------------------------------------------------------------------------
# Pallas kernel: one grid step == one chunk of Tc timesteps
# ----------------------------------------------------------------------------
def _lstm_chunk_kernel(x_ref, wih_ref, whh_ref, bias_ref, out_ref,
                       h_scr, c_scr, gx_scr):
    """Serial LSTM recurrence over one time chunk.

    x_ref   : (Bs, Tc, I)  f32  input chunk (batch_first)
    wih_ref : (I, 4H)      f32  input weight (transposed), grid-invariant
    whh_ref : (H, 4H)      f32  recurrent weight (transposed), grid-invariant
    bias_ref: (1, 4H)      f32  b_ih + b_hh
    out_ref : (Bs, Tc*H)   f32  lane-dense hidden-state slab for this chunk
    h_scr, c_scr: (Bs, H)  f32  recurrent state, persists across grid steps
    gx_scr  : (Bs, Tc, 4H) f32  per-chunk precomputed input projection
    """
    Bs, Tc, I = x_ref.shape
    H = h_scr.shape[-1]
    G = 4 * H

    # Reset the recurrent state at the start of each sequence (chunk axis 0).
    @pl.when(pl.program_id(1) == 0)
    def _():
        h_scr[...] = jnp.zeros_like(h_scr)
        c_scr[...] = jnp.zeros_like(c_scr)

    # ---- fused input projection: one MXU pass per chunk, off the per-step
    # ---- critical path; result parked in VMEM scratch (not registers).
    xw = jnp.dot(x_ref[...].reshape(Bs * Tc, I), wih_ref[...],
                 preferred_element_type=jnp.float32)             # (Bs*Tc, 4H)
    gx_scr[...] = xw.reshape(Bs, Tc, G) + bias_ref[...][None, :, :]

    # ---- serial recurrence over the chunk ----------------------------------
    whh = whh_ref[...]                                           # (H, 4H)
    h = h_scr[...]                                               # (Bs, H)
    c = c_scr[...]                                               # (Bs, H)

    # Static unroll with static slice indices; only h/c are loop-carried so
    # register pressure stays bounded even for large Tc.
    for t in range(Tc):
        g = gx_scr[:, t, :] + jnp.dot(h, whh,
                                      preferred_element_type=jnp.float32)
        sg = jax.nn.sigmoid(g)        # full-width (Bs, 4H) EUP pass
        tg = jnp.tanh(g)              # full-width (Bs, 4H) EUP pass
        i_g = sg[:, 0 * H:1 * H]
        f_g = sg[:, 1 * H:2 * H]
        c_g = tg[:, 2 * H:3 * H]
        o_g = sg[:, 3 * H:4 * H]
        c = f_g * c + i_g * c_g
        h = o_g * jnp.tanh(c)
        # Static-offset store into the lane-dense output slab.
        out_ref[:, t * H:(t + 1) * H] = h

    h_scr[...] = h
    c_scr[...] = c


# ----------------------------------------------------------------------------
# Chunk-size selection: multiple of 8 (sublane) and of 128/gcd(H,128) so the
# output slab last dim Tc*H is a multiple of 128; capped by a VMEM budget.
# ----------------------------------------------------------------------------
def _time_chunk_step(H):
    lane_q = 128 // math.gcd(H, 128)
    return 8 * lane_q // math.gcd(8, lane_q)          # lcm(8, lane_q)


def _choose_time_chunk(Bs, T, I, H, *, max_chunk=64, vmem_budget=12 << 20):
    G = 4 * H
    step = _time_chunk_step(H)
    tc_full = -(-T // step) * step                    # round_up(T, step)
    tc = min(tc_full, max(step, (max_chunk // step) * step))

    def vmem_bytes(tc):
        return 4 * (2 * Bs * tc * I                   # x chunk, double-buffered
                    + 2 * Bs * tc * H                 # out chunk, double-buffered
                    + Bs * tc * G                     # gx scratch
                    + 2 * ((I + H) * G + G)           # weights + bias
                    + 2 * Bs * H)                     # h / c state

    while tc > step and vmem_bytes(tc) > vmem_budget:
        tc -= step
    return tc


# ----------------------------------------------------------------------------
# Wrapper
# ----------------------------------------------------------------------------
def lstm_forward(x, params, *, time_chunk=None, batch_shards=1):
    """x: (B, T, I) batch_first float32 -> (B, T, H) hidden sequence.

    batch_shards > 1 adds a leading "parallel" grid axis over batch (useful on
    v7x with 2 TensorCores); B must then be divisible by batch_shards and the
    per-shard batch should be a multiple of 8 (or equal to B) for clean tiling.
    """
    wih, whh, bih, bhh = params
    B, T, I = x.shape
    H = whh.shape[1]
    G = 4 * H

    assert B % batch_shards == 0, "batch_shards must divide batch"
    Bs = B // batch_shards

    step = _time_chunk_step(H)
    if time_chunk is None:
        Tc = _choose_time_chunk(Bs, T, I, H)
    else:
        Tc = -(-int(time_chunk) // step) * step

    Tp = -(-T // Tc) * Tc
    n_chunks = Tp // Tc

    xf = x.astype(jnp.float32)
    if Tp != T:
        xf = jnp.pad(xf, ((0, 0), (0, Tp - T), (0, 0)))

    # Weights kept in f32 (tiny) to avoid bf16 error compounding through the
    # recurrence; biases folded together and added once per chunk.
    wih_t = wih.T.astype(jnp.float32)                  # (I, 4H)
    whh_t = whh.T.astype(jnp.float32)                  # (H, 4H)
    bias = (bih + bhh).astype(jnp.float32).reshape(1, G)

    out_flat = pl.pallas_call(
        _lstm_chunk_kernel,
        out_shape=jax.ShapeDtypeStruct((B, Tp * H), jnp.float32),
        grid_spec=pltpu.PrefetchScalarGridSpec(
            num_scalar_prefetch=0,
            grid=(batch_shards, n_chunks),
            in_specs=[
                pl.BlockSpec((Bs, Tc, I), lambda b, c: (b, c, 0)),   # x chunk
                pl.BlockSpec((I, G), lambda b, c: (0, 0)),           # W_ih^T
                pl.BlockSpec((H, G), lambda b, c: (0, 0)),           # W_hh^T
                pl.BlockSpec((1, G), lambda b, c: (0, 0)),           # bias
            ],
            out_specs=pl.BlockSpec((Bs, Tc * H), lambda b, c: (b, c)),
            scratch_shapes=[
                pltpu.VMEM((Bs, H), jnp.float32),       # h state
                pltpu.VMEM((Bs, H), jnp.float32),       # c state
                pltpu.VMEM((Bs, Tc, G), jnp.float32),   # per-chunk gx
            ],
        ),
        compiler_params=pltpu.CompilerParams(
            dimension_semantics=("parallel", "arbitrary"),
            vmem_limit_bytes=32 * 1024 * 1024),
    )(xf, wih_t, whh_t, bias)

    out = out_flat.reshape(B, Tp, H)
    return out[:, :T, :] if Tp != T else out


# ----------------------------------------------------------------------------
# Pure-JAX reference (same math as nn.LSTM, unidirectional, batch_first)
# ----------------------------------------------------------------------------
def lstm_reference(x, params):
    wih, whh, bih, bhh = params
    B, T, I = x.shape
    H = whh.shape[1]

    def step(carry, xt):
        h, c = carry
        g = xt @ wih.T + h @ whh.T + bih + bhh
        i = jax.nn.sigmoid(g[:, 0 * H:1 * H])
        f = jax.nn.sigmoid(g[:, 1 * H:2 * H])
        gg = jnp.tanh(g[:, 2 * H:3 * H])
        o = jax.nn.sigmoid(g[:, 3 * H:4 * H])
        c = f * c + i * gg
        h = o * jnp.tanh(c)
        return (h, c), h

    xs = jnp.transpose(x, (1, 0, 2))                 # (T, B, I)
    init = (jnp.zeros((B, H), jnp.float32), jnp.zeros((B, H), jnp.float32))
    _, hs = lax.scan(step, init, xs)
    return jnp.transpose(hs, (1, 0, 2))              # (B, T, H)


# ----------------------------------------------------------------------------
# Parameter init (deterministic, PyTorch-style U(-1/sqrt(H), 1/sqrt(H)))
# ----------------------------------------------------------------------------
def init_params(key, input_size, hidden_size):
    scale = 1.0 / math.sqrt(hidden_size)
    ks = jax.random.split(key, 4)
    u = lambda k, shape: jax.random.uniform(k, shape, jnp.float32, -scale, scale)
    wih = u(ks[0], (4 * hidden_size, input_size))
    whh = u(ks[1], (4 * hidden_size, hidden_size))
    bih = u(ks[2], (4 * hidden_size,))
    bhh = u(ks[3], (4 * hidden_size,))
    return (wih, whh, bih, bhh)


if __name__ == "__main__":
    B, T, INPUT, HIDDEN = 2, 16, 16, 32

    key = jax.random.PRNGKey(0)
    kx, kp = jax.random.split(key)
    x = jax.random.normal(kx, (B, T, INPUT), jnp.float32)
    params = init_params(kp, INPUT, HIDDEN)

    out = lstm_forward(x, params)          # Tc=16 -> single grid step here
    out = jax.block_until_ready(out)

    ref = lstm_reference(x, params)
    assert out.shape == (B, T, HIDDEN)
    # All-f32 weights and accumulation -> tight tolerance vs. reference.
    assert jnp.allclose(out, ref, atol=1e-4, rtol=1e-4), "mismatch vs. reference"

    print("KERNEL_OK")
</pallas_src>

<mosaic_0001>
module attributes {stable_mosaic.version = 11 : i64} {
  func.func @_lstm_chunk_kernel(%arg0: i32, %arg1: i32, %arg2: memref<2x16x16xf32, #tpu.memory_space<vmem>>, %arg3: memref<16x128xf32, #tpu.memory_space<vmem>>, %arg4: memref<32x128xf32, #tpu.memory_space<vmem>>, %arg5: memref<1x128xf32, #tpu.memory_space<vmem>>, %arg6: memref<2x512xf32, #tpu.memory_space<vmem>>, %arg7: memref<2x32xf32, #tpu.memory_space<vmem>>, %arg8: memref<2x32xf32, #tpu.memory_space<vmem>>, %arg9: memref<2x16x128xf32, #tpu.memory_space<vmem>>) attributes {dimension_semantics = [#tpu.dimension_semantics<parallel>, #tpu.dimension_semantics<arbitrary>], iteration_bounds = array<i64: 1, 1>, scalar_prefetch = 0 : i64, scratch_operands = 3 : i64, tpu.core_type = #tpu.core_type<tc>, window_params = [{transform_indices = @transform_0, window_bounds = array<i64: 2, 16, 16>}, {pipeline_mode = #tpu.pipeline_mode<synchronous>, transform_indices = @transform_1, window_bounds = array<i64: 16, 128>}, {pipeline_mode = #tpu.pipeline_mode<synchronous>, transform_indices = @transform_2, window_bounds = array<i64: 32, 128>}, {pipeline_mode = #tpu.pipeline_mode<synchronous>, transform_indices = @transform_3, window_bounds = array<i64: 1, 128>}, {transform_indices = @transform_4, window_bounds = array<i64: 2, 512>}]} {
    %c0_i32 = arith.constant 0 : i32
    %0 = arith.cmpi eq, %arg1, %c0_i32 : i32
    %1 = arith.extui %0 : i1 to i32
    %c0_i32_0 = arith.constant 0 : i32
    %2 = arith.cmpi ne, %1, %c0_i32_0 : i32
    scf.if %2 {
      %cst_102 = arith.constant 0.000000e+00 : f32
      %338 = vector.broadcast %cst_102 : f32 to vector<2x32xf32>
      %c0_103 = arith.constant 0 : index
      %c0_104 = arith.constant 0 : index
      %339 = vector.load %arg7[%c0_103, %c0_104] : memref<2x32xf32, #tpu.memory_space<vmem>>, vector<2x32xf32>
      tpu.vector_store %arg7[%c0_103, %c0_104], %338 {strides = array<i32>} : memref<2x32xf32, #tpu.memory_space<vmem>>, vector<2x32xf32>,
      %cst_105 = arith.constant 0.000000e+00 : f32
      %340 = vector.broadcast %cst_105 : f32 to vector<2x32xf32>
      %c0_106 = arith.constant 0 : index
      %c0_107 = arith.constant 0 : index
      %341 = vector.load %arg8[%c0_106, %c0_107] : memref<2x32xf32, #tpu.memory_space<vmem>>, vector<2x32xf32>
      tpu.vector_store %arg8[%c0_106, %c0_107], %340 {strides = array<i32>} : memref<2x32xf32, #tpu.memory_space<vmem>>, vector<2x32xf32>,
    } else {
    }
    %c0 = arith.constant 0 : index
    %c0_1 = arith.constant 0 : index
    %c0_2 = arith.constant 0 : index
    %3 = vector.load %arg2[%c0, %c0_1, %c0_2] : memref<2x16x16xf32, #tpu.memory_space<vmem>>, vector<2x16x16xf32>
    %4 = vector.shape_cast %3 : vector<2x16x16xf32> to vector<32x16xf32>
    %c0_3 = arith.constant 0 : index
    %c0_4 = arith.constant 0 : index
    %5 = vector.load %arg3[%c0_3, %c0_4] : memref<16x128xf32, #tpu.memory_space<vmem>>, vector<16x128xf32>
    %cst = arith.constant dense<0.000000e+00> : vector<32x128xf32>
    %6 = tpu.matmul %4, %5, %cst {dimension_numbers = #tpu.dot_dimension_numbers<[1], [0], [0], [1], [0, 0, 1, 1], [], []>} : vector<32x16xf32>, vector<16x128xf32>, vector<32x128xf32> -> vector<32x128xf32>
    %7 = vector.shape_cast %6 : vector<32x128xf32> to vector<2x16x128xf32>
    %c0_5 = arith.constant 0 : index
    %c0_6 = arith.constant 0 : index
    %8 = vector.load %arg5[%c0_5, %c0_6] : memref<1x128xf32, #tpu.memory_space<vmem>>, vector<1x128xf32>
    %9 = vector.shape_cast %8 : vector<1x128xf32> to vector<1x1x128xf32>
    %10 = vector.broadcast %9 : vector<1x1x128xf32> to vector<2x16x128xf32>
    %11 = arith.addf %7, %10 : vector<2x16x128xf32>
    %c0_7 = arith.constant 0 : index
    %c0_8 = arith.constant 0 : index
    %c0_9 = arith.constant 0 : index
    %12 = vector.load %arg9[%c0_7, %c0_8, %c0_9] : memref<2x16x128xf32, #tpu.memory_space<vmem>>, vector<2x16x128xf32>
    tpu.vector_store %arg9[%c0_7, %c0_8, %c0_9], %11 {strides = array<i32>} : memref<2x16x128xf32, #tpu.memory_space<vmem>>, vector<2x16x128xf32>,
    %c0_10 = arith.constant 0 : index
    %c0_11 = arith.constant 0 : index
    %13 = vector.load %arg4[%c0_10, %c0_11] : memref<32x128xf32, #tpu.memory_space<vmem>>, vector<32x128xf32>
    %c0_12 = arith.constant 0 : index
    %c0_13 = arith.constant 0 : index
    %14 = vector.load %arg7[%c0_12, %c0_13] : memref<2x32xf32, #tpu.memory_space<vmem>>, vector<2x32xf32>
    %c0_14 = arith.constant 0 : index
    %c0_15 = arith.constant 0 : index
    %15 = vector.load %arg8[%c0_14, %c0_15] : memref<2x32xf32, #tpu.memory_space<vmem>>, vector<2x32xf32>
    %c0_16 = arith.constant 0 : index
    %c0_17 = arith.constant 0 : index
    %c0_18 = arith.constant 0 : index
    %16 = vector.load %arg9[%c0_16, %c0_17, %c0_18] : memref<2x16x128xf32, #tpu.memory_space<vmem>>, vector<2x1x128xf32>
    %17 = vector.shape_cast %16 : vector<2x1x128xf32> to vector<2x128xf32>
    %cst_19 = arith.constant dense<0.000000e+00> : vector<2x128xf32>
    %18 = tpu.matmul %14, %13, %cst_19 {dimension_numbers = #tpu.dot_dimension_numbers<[1], [0], [0], [1], [0, 0, 1, 1], [], []>} : vector<2x32xf32>, vector<32x128xf32>, vector<2x128xf32> -> vector<2x128xf32>
    %19 = arith.addf %17, %18 : vector<2x128xf32>
    %20 = arith.negf %19 : vector<2x128xf32>
    %21 = math.exp %20 : vector<2x128xf32>
    %cst_20 = arith.constant 1.000000e+00 : f32
    %22 = vector.broadcast %cst_20 : f32 to vector<2x128xf32>
    %23 = arith.addf %22, %21 : vector<2x128xf32>
    %24 = arith.divf %22, %23 : vector<2x128xf32>
    %25 = math.tanh %19 : vector<2x128xf32>
    %26 = vector.extract_strided_slice %24 {offsets = [0, 0], sizes = [2, 32], strides = [1, 1]} : vector<2x128xf32> to vector<2x32xf32>
    %27 = vector.extract_strided_slice %24 {offsets = [0, 32], sizes = [2, 32], strides = [1, 1]} : vector<2x128xf32> to vector<2x32xf32>
    %28 = vector.extract_strided_slice %25 {offsets = [0, 64], sizes = [2, 32], strides = [1, 1]} : vector<2x128xf32> to vector<2x32xf32>
    %29 = vector.extract_strided_slice %24 {offsets = [0, 96], sizes = [2, 32], strides = [1, 1]} : vector<2x128xf32> to vector<2x32xf32>
    %30 = arith.mulf %27, %15 : vector<2x32xf32>
    %31 = arith.mulf %26, %28 : vector<2x32xf32>
    %32 = arith.addf %30, %31 : vector<2x32xf32>
    %33 = math.tanh %32 : vector<2x32xf32>
    %34 = arith.mulf %29, %33 : vector<2x32xf32>
    %c0_21 = arith.constant 0 : index
    %c0_22 = arith.constant 0 : index
    %35 = vector.load %arg6[%c0_21, %c0_22] : memref<2x512xf32, #tpu.memory_space<vmem>>, vector<2x32xf32>
    tpu.vector_store %arg6[%c0_21, %c0_22], %34 {strides = array<i32>} : memref<2x512xf32, #tpu.memory_space<vmem>>, vector<2x32xf32>,
    %c0_23 = arith.constant 0 : index
    %c1 = arith.constant 1 : index
    %c0_24 = arith.constant 0 : index
    %36 = vector.load %arg9[%c0_23, %c1, %c0_24] : memref<2x16x128xf32, #tpu.memory_space<vmem>>, vector<2x1x128xf32>
    %37 = vector.shape_cast %36 : vector<2x1x128xf32> to vector<2x128xf32>
    %cst_25 = arith.constant dense<0.000000e+00> : vector<2x128xf32>
    %38 = tpu.matmul %34, %13, %cst_25 {dimension_numbers = #tpu.dot_dimension_numbers<[1], [0], [0], [1], [0, 0, 1, 1], [], []>} : vector<2x32xf32>, vector<32x128xf32>, vector<2x128xf32> -> vector<2x128xf32>
    %39 = arith.addf %37, %38 : vector<2x128xf32>
    %40 = arith.negf %39 : vector<2x128xf32>
    %41 = math.exp %40 : vector<2x128xf32>
    %cst_26 = arith.constant 1.000000e+00 : f32
    %42 = vector.broadcast %cst_26 : f32 to vector<2x128xf32>
    %43 = arith.addf %42, %41 : vector<2x128xf32>
    %44 = arith.divf %42, %43 : vector<2x128xf32>
    %45 = math.tanh %39 : vector<2x128xf32>
    %46 = vector.extract_strided_slice %44 {offsets = [0, 0], sizes = [2, 32], strides = [1, 1]} : vector<2x128xf32> to vector<2x32xf32>
    %47 = vector.extract_strided_slice %44 {offsets = [0, 32], sizes = [2, 32], strides = [1, 1]} : vector<2x128xf32> to vector<2x32xf32>
    %48 = vector.extract_strided_slice %45 {offsets = [0, 64], sizes = [2, 32], strides = [1, 1]} : vector<2x128xf32> to vector<2x32xf32>
    %49 = vector.extract_strided_slice %44 {offsets = [0, 96], sizes = [2, 32], strides = [1, 1]} : vector<2x128xf32> to vector<2x32xf32>
    %50 = arith.mulf %47, %32 : vector<2x32xf32>
    %51 = arith.mulf %46, %48 : vector<2x32xf32>
    %52 = arith.addf %50, %51 : vector<2x32xf32>
    %53 = math.tanh %52 : vector<2x32xf32>
    %54 = arith.mulf %49, %53 : vector<2x32xf32>
    %c0_27 = arith.constant 0 : index
    %c32 = arith.constant 32 : index
    %55 = vector.load %arg6[%c0_27, %c32] : memref<2x512xf32, #tpu.memory_space<vmem>>, vector<2x32xf32>
    tpu.vector_store %arg6[%c0_27, %c32], %54 {strides = array<i32>} : memref<2x512xf32, #tpu.memory_space<vmem>>, vector<2x32xf32>,
    %c0_28 = arith.constant 0 : index
    %c2 = arith.constant 2 : index
    %c0_29 = arith.constant 0 : index
    %56 = vector.load %arg9[%c0_28, %c2, %c0_29] : memref<2x16x128xf32, #tpu.memory_space<vmem>>, vector<2x1x128xf32>
    %57 = vector.shape_cast %56 : vector<2x1x128xf32> to vector<2x128xf32>
    %cst_30 = arith.constant dense<0.000000e+00> : vector<2x128xf32>
    %58 = tpu.matmul %54, %13, %cst_30 {dimension_numbers = #tpu.dot_dimension_numbers<[1], [0], [0], [1], [0, 0, 1, 1], [], []>} : vector<2x32xf32>, vector<32x128xf32>, vector<2x128xf32> -> vector<2x128xf32>
    %59 = arith.addf %57, %58 : vector<2x128xf32>
    %60 = arith.negf %59 : vector<2x128xf32>
    %61 = math.exp %60 : vector<2x128xf32>
    %cst_31 = arith.constant 1.000000e+00 : f32
    %62 = vector.broadcast %cst_31 : f32 to vector<2x128xf32>
    %63 = arith.addf %62, %61 : vector<2x128xf32>
    %64 = arith.divf %62, %63 : vector<2x128xf32>
    %65 = math.tanh %59 : vector<2x128xf32>
    %66 = vector.extract_strided_slice %64 {offsets = [0, 0], sizes = [2, 32], strides = [1, 1]} : vector<2x128xf32> to vector<2x32xf32>
    %67 = vector.extract_strided_slice %64 {offsets = [0, 32], sizes = [2, 32], strides = [1, 1]} : vector<2x128xf32> to vector<2x32xf32>
    %68 = vector.extract_strided_slice %65 {offsets = [0, 64], sizes = [2, 32], strides = [1, 1]} : vector<2x128xf32> to vector<2x32xf32>
    %69 = vector.extract_strided_slice %64 {offsets = [0, 96], sizes = [2, 32], strides = [1, 1]} : vector<2x128xf32> to vector<2x32xf32>
    %70 = arith.mulf %67, %52 : vector<2x32xf32>
    %71 = arith.mulf %66, %68 : vector<2x32xf32>
    %72 = arith.addf %70, %71 : vector<2x32xf32>
    %73 = math.tanh %72 : vector<2x32xf32>
    %74 = arith.mulf %69, %73 : vector<2x32xf32>
    %c0_32 = arith.constant 0 : index
    %c64 = arith.constant 64 : index
    %75 = vector.load %arg6[%c0_32, %c64] : memref<2x512xf32, #tpu.memory_space<vmem>>, vector<2x32xf32>
    tpu.vector_store %arg6[%c0_32, %c64], %74 {strides = array<i32>} : memref<2x512xf32, #tpu.memory_space<vmem>>, vector<2x32xf32>,
    %c0_33 = arith.constant 0 : index
    %c3 = arith.constant 3 : index
    %c0_34 = arith.constant 0 : index
    %76 = vector.load %arg9[%c0_33, %c3, %c0_34] : memref<2x16x128xf32, #tpu.memory_space<vmem>>, vector<2x1x128xf32>
    %77 = vector.shape_cast %76 : vector<2x1x128xf32> to vector<2x128xf32>
    %cst_35 = arith.constant dense<0.000000e+00> : vector<2x128xf32>
    %78 = tpu.matmul %74, %13, %cst_35 {dimension_numbers = #tpu.dot_dimension_numbers<[1], [0], [0], [1], [0, 0, 1, 1], [], []>} : vector<2x32xf32>, vector<32x128xf32>, vector<2x128xf32> -> vector<2x128xf32>
    %79 = arith.addf %77, %78 : vector<2x128xf32>
    %80 = arith.negf %79 : vector<2x128xf32>
    %81 = math.exp %80 : vector<2x128xf32>
    %cst_36 = arith.constant 1.000000e+00 : f32
    %82 = vector.broadcast %cst_36 : f32 to vector<2x128xf32>
    %83 = arith.addf %82, %81 : vector<2x128xf32>
    %84 = arith.divf %82, %83 : vector<2x128xf32>
    %85 = math.tanh %79 : vector<2x128xf32>
    %86 = vector.extract_strided_slice %84 {offsets = [0, 0], sizes = [2, 32], strides = [1, 1]} : vector<2x128xf32> to vector<2x32xf32>
    %87 = vector.extract_strided_slice %84 {offsets = [0, 32], sizes = [2, 32], strides = [1, 1]} : vector<2x128xf32> to vector<2x32xf32>
    %88 = vector.extract_strided_slice %85 {offsets = [0, 64], sizes = [2, 32], strides = [1, 1]} : vector<2x128xf32> to vector<2x32xf32>
    %89 = vector.extract_strided_slice %84 {offsets = [0, 96], sizes = [2, 32], strides = [1, 1]} : vector<2x128xf32> to vector<2x32xf32>
    %90 = arith.mulf %87, %72 : vector<2x32xf32>
    %91 = arith.mulf %86, %88 : vector<2x32xf32>
    %92 = arith.addf %90, %91 : vector<2x32xf32>
    %93 = math.tanh %92 : vector<2x32xf32>
    %94 = arith.mulf %89, %93 : vector<2x32xf32>
    %c0_37 = arith.constant 0 : index
    %c96 = arith.constant 96 : index
    %95 = vector.load %arg6[%c0_37, %c96] : memref<2x512xf32, #tpu.memory_space<vmem>>, vector<2x32xf32>
    tpu.vector_store %arg6[%c0_37, %c96], %94 {strides = array<i32>} : memref<2x512xf32, #tpu.memory_space<vmem>>, vector<2x32xf32>,
    %c0_38 = arith.constant 0 : index
    %c4 = arith.constant 4 : index
    %c0_39 = arith.constant 0 : index
    %96 = vector.load %arg9[%c0_38, %c4, %c0_39] : memref<2x16x128xf32, #tpu.memory_space<vmem>>, vector<2x1x128xf32>
    %97 = vector.shape_cast %96 : vector<2x1x128xf32> to vector<2x128xf32>
    %cst_40 = arith.constant dense<0.000000e+00> : vector<2x128xf32>
    %98 = tpu.matmul %94, %13, %cst_40 {dimension_numbers = #tpu.dot_dimension_numbers<[1], [0], [0], [1], [0, 0, 1, 1], [], []>} : vector<2x32xf32>, vector<32x128xf32>, vector<2x128xf32> -> vector<2x128xf32>
    %99 = arith.addf %97, %98 : vector<2x128xf32>
    %100 = arith.negf %99 : vector<2x128xf32>
    %101 = math.exp %100 : vector<2x128xf32>
    %cst_41 = arith.constant 1.000000e+00 : f32
    %102 = vector.broadcast %cst_41 : f32 to vector<2x128xf32>
    %103 = arith.addf %102, %101 : vector<2x128xf32>
    %104 = arith.divf %102, %103 : vector<2x128xf32>
    %105 = math.tanh %99 : vector<2x128xf32>
    %106 = vector.extract_strided_slice %104 {offsets = [0, 0], sizes = [2, 32], strides = [1, 1]} : vector<2x128xf32> to vector<2x32xf32>
    %107 = vector.extract_strided_slice %104 {offsets = [0, 32], sizes = [2, 32], strides = [1, 1]} : vector<2x128xf32> to vector<2x32xf32>
    %108 = vector.extract_strided_slice %105 {offsets = [0, 64], sizes = [2, 32], strides = [1, 1]} : vector<2x128xf32> to vector<2x32xf32>
    %109 = vector.extract_strided_slice %104 {offsets = [0, 96], sizes = [2, 32], strides = [1, 1]} : vector<2x128xf32> to vector<2x32xf32>
    %110 = arith.mulf %107, %92 : vector<2x32xf32>
    %111 = arith.mulf %106, %108 : vector<2x32xf32>
    %112 = arith.addf %110, %111 : vector<2x32xf32>
    %113 = math.tanh %112 : vector<2x32xf32>
    %114 = arith.mulf %109, %113 : vector<2x32xf32>
    %c0_42 = arith.constant 0 : index
    %c128 = arith.constant 128 : index
    %115 = vector.load %arg6[%c0_42, %c128] : memref<2x512xf32, #tpu.memory_space<vmem>>, vector<2x32xf32>
    tpu.vector_store %arg6[%c0_42, %c128], %114 {strides = array<i32>} : memref<2x512xf32, #tpu.memory_space<vmem>>, vector<2x32xf32>,
    %c0_43 = arith.constant 0 : index
    %c5 = arith.constant 5 : index
    %c0_44 = arith.constant 0 : index
    %116 = vector.load %arg9[%c0_43, %c5, %c0_44] : memref<2x16x128xf32, #tpu.memory_space<vmem>>, vector<2x1x128xf32>
    %117 = vector.shape_cast %116 : vector<2x1x128xf32> to vector<2x128xf32>
    %cst_45 = arith.constant dense<0.000000e+00> : vector<2x128xf32>
    %118 = tpu.matmul %114, %13, %cst_45 {dimension_numbers = #tpu.dot_dimension_numbers<[1], [0], [0], [1], [0, 0, 1, 1], [], []>} : vector<2x32xf32>, vector<32x128xf32>, vector<2x128xf32> -> vector<2x128xf32>
    %119 = arith.addf %117, %118 : vector<2x128xf32>
    %120 = arith.negf %119 : vector<2x128xf32>
    %121 = math.exp %120 : vector<2x128xf32>
    %cst_46 = arith.constant 1.000000e+00 : f32
    %122 = vector.broadcast %cst_46 : f32 to vector<2x128xf32>
    %123 = arith.addf %122, %121 : vector<2x128xf32>
    %124 = arith.divf %122, %123 : vector<2x128xf32>
    %125 = math.tanh %119 : vector<2x128xf32>
    %126 = vector.extract_strided_slice %124 {offsets = [0, 0], sizes = [2, 32], strides = [1, 1]} : vector<2x128xf32> to vector<2x32xf32>
    %127 = vector.extract_strided_slice %124 {offsets = [0, 32], sizes = [2, 32], strides = [1, 1]} : vector<2x128xf32> to vector<2x32xf32>
    %128 = vector.extract_strided_slice %125 {offsets = [0, 64], sizes = [2, 32], strides = [1, 1]} : vector<2x128xf32> to vector<2x32xf32>
    %129 = vector.extract_strided_slice %124 {offsets = [0, 96], sizes = [2, 32], strides = [1, 1]} : vector<2x128xf32> to vector<2x32xf32>
    %130 = arith.mulf %127, %112 : vector<2x32xf32>
    %131 = arith.mulf %126, %128 : vector<2x32xf32>
    %132 = arith.addf %130, %131 : vector<2x32xf32>
    %133 = math.tanh %132 : vector<2x32xf32>
    %134 = arith.mulf %129, %133 : vector<2x32xf32>
    %c0_47 = arith.constant 0 : index
    %c160 = arith.constant 160 : index
    %135 = vector.load %arg6[%c0_47, %c160] : memref<2x512xf32, #tpu.memory_space<vmem>>, vector<2x32xf32>
    tpu.vector_store %arg6[%c0_47, %c160], %134 {strides = array<i32>} : memref<2x512xf32, #tpu.memory_space<vmem>>, vector<2x32xf32>,
    %c0_48 = arith.constant 0 : index
    %c6 = arith.constant 6 : index
    %c0_49 = arith.constant 0 : index
    %136 = vector.load %arg9[%c0_48, %c6, %c0_49] : memref<2x16x128xf32, #tpu.memory_space<vmem>>, vector<2x1x128xf32>
    %137 = vector.shape_cast %136 : vector<2x1x128xf32> to vector<2x128xf32>
    %cst_50 = arith.constant dense<0.000000e+00> : vector<2x128xf32>
    %138 = tpu.matmul %134, %13, %cst_50 {dimension_numbers = #tpu.dot_dimension_numbers<[1], [0], [0], [1], [0, 0, 1, 1], [], []>} : vector<2x32xf32>, vector<32x128xf32>, vector<2x128xf32> -> vector<2x128xf32>
    %139 = arith.addf %137, %138 : vector<2x128xf32>
    %140 = arith.negf %139 : vector<2x128xf32>
    %141 = math.exp %140 : vector<2x128xf32>
    %cst_51 = arith.constant 1.000000e+00 : f32
    %142 = vector.broadcast %cst_51 : f32 to vector<2x128xf32>
    %143 = arith.addf %142, %141 : vector<2x128xf32>
    %144 = arith.divf %142, %143 : vector<2x128xf32>
    %145 = math.tanh %139 : vector<2x128xf32>
    %146 = vector.extract_strided_slice %144 {offsets = [0, 0], sizes = [2, 32], strides = [1, 1]} : vector<2x128xf32> to vector<2x32xf32>
    %147 = vector.extract_strided_slice %144 {offsets = [0, 32], sizes = [2, 32], strides = [1, 1]} : vector<2x128xf32> to vector<2x32xf32>
    %148 = vector.extract_strided_slice %145 {offsets = [0, 64], sizes = [2, 32], strides = [1, 1]} : vector<2x128xf32> to vector<2x32xf32>
    %149 = vector.extract_strided_slice %144 {offsets = [0, 96], sizes = [2, 32], strides = [1, 1]} : vector<2x128xf32> to vector<2x32xf32>
    %150 = arith.mulf %147, %132 : vector<2x32xf32>
    %151 = arith.mulf %146, %148 : vector<2x32xf32>
    %152 = arith.addf %150, %151 : vector<2x32xf32>
    %153 = math.tanh %152 : vector<2x32xf32>
    %154 = arith.mulf %149, %153 : vector<2x32xf32>
    %c0_52 = arith.constant 0 : index
    %c192 = arith.constant 192 : index
    %155 = vector.load %arg6[%c0_52, %c192] : memref<2x512xf32, #tpu.memory_space<vmem>>, vector<2x32xf32>
    tpu.vector_store %arg6[%c0_52, %c192], %154 {strides = array<i32>} : memref<2x512xf32, #tpu.memory_space<vmem>>, vector<2x32xf32>,
    %c0_53 = arith.constant 0 : index
    %c7 = arith.constant 7 : index
    %c0_54 = arith.constant 0 : index
    %156 = vector.load %arg9[%c0_53, %c7, %c0_54] : memref<2x16x128xf32, #tpu.memory_space<vmem>>, vector<2x1x128xf32>
    %157 = vector.shape_cast %156 : vector<2x1x128xf32> to vector<2x128xf32>
    %cst_55 = arith.constant dense<0.000000e+00> : vector<2x128xf32>
    %158 = tpu.matmul %154, %13, %cst_55 {dimension_numbers = #tpu.dot_dimension_numbers<[1], [0], [0], [1], [0, 0, 1, 1], [], []>} : vector<2x32xf32>, vector<32x128xf32>, vector<2x128xf32> -> vector<2x128xf32>
    %159 = arith.addf %157, %158 : vector<2x128xf32>
    %160 = arith.negf %159 : vector<2x128xf32>
    %161 = math.exp %160 : vector<2x128xf32>
    %cst_56 = arith.constant 1.000000e+00 : f32
    %162 = vector.broadcast %cst_56 : f32 to vector<2x128xf32>
    %163 = arith.addf %162, %161 : vector<2x128xf32>
    %164 = arith.divf %162, %163 : vector<2x128xf32>
    %165 = math.tanh %159 : vector<2x128xf32>
    %166 = vector.extract_strided_slice %164 {offsets = [0, 0], sizes = [2, 32], strides = [1, 1]} : vector<2x128xf32> to vector<2x32xf32>
    %167 = vector.extract_strided_slice %164 {offsets = [0, 32], sizes = [2, 32], strides = [1, 1]} : vector<2x128xf32> to vector<2x32xf32>
    %168 = vector.extract_strided_slice %165 {offsets = [0, 64], sizes = [2, 32], strides = [1, 1]} : vector<2x128xf32> to vector<2x32xf32>
    %169 = vector.extract_strided_slice %164 {offsets = [0, 96], sizes = [2, 32], strides = [1, 1]} : vector<2x128xf32> to vector<2x32xf32>
    %170 = arith.mulf %167, %152 : vector<2x32xf32>
    %171 = arith.mulf %166, %168 : vector<2x32xf32>
    %172 = arith.addf %170, %171 : vector<2x32xf32>
    %173 = math.tanh %172 : vector<2x32xf32>
    %174 = arith.mulf %169, %173 : vector<2x32xf32>
    %c0_57 = arith.constant 0 : index
    %c224 = arith.constant 224 : index
    %175 = vector.load %arg6[%c0_57, %c224] : memref<2x512xf32, #tpu.memory_space<vmem>>, vector<2x32xf32>
    tpu.vector_store %arg6[%c0_57, %c224], %174 {strides = array<i32>} : memref<2x512xf32, #tpu.memory_space<vmem>>, vector<2x32xf32>,
    %c0_58 = arith.constant 0 : index
    %c8 = arith.constant 8 : index
    %c0_59 = arith.constant 0 : index
    %176 = vector.load %arg9[%c0_58, %c8, %c0_59] : memref<2x16x128xf32, #tpu.memory_space<vmem>>, vector<2x1x128xf32>
    %177 = vector.shape_cast %176 : vector<2x1x128xf32> to vector<2x128xf32>
    %cst_60 = arith.constant dense<0.000000e+00> : vector<2x128xf32>
    %178 = tpu.matmul %174, %13, %cst_60 {dimension_numbers = #tpu.dot_dimension_numbers<[1], [0], [0], [1], [0, 0, 1, 1], [], []>} : vector<2x32xf32>, vector<32x128xf32>, vector<2x128xf32> -> vector<2x128xf32>
    %179 = arith.addf %177, %178 : vector<2x128xf32>
    %180 = arith.negf %179 : vector<2x128xf32>
    %181 = math.exp %180 : vector<2x128xf32>
    %cst_61 = arith.constant 1.000000e+00 : f32
    %182 = vector.broadcast %cst_61 : f32 to vector<2x128xf32>
    %183 = arith.addf %182, %181 : vector<2x128xf32>
    %184 = arith.divf %182, %183 : vector<2x128xf32>
    %185 = math.tanh %179 : vector<2x128xf32>
    %186 = vector.extract_strided_slice %184 {offsets = [0, 0], sizes = [2, 32], strides = [1, 1]} : vector<2x128xf32> to vector<2x32xf32>
    %187 = vector.extract_strided_slice %184 {offsets = [0, 32], sizes = [2, 32], strides = [1, 1]} : vector<2x128xf32> to vector<2x32xf32>
    %188 = vector.extract_strided_slice %185 {offsets = [0, 64], sizes = [2, 32], strides = [1, 1]} : vector<2x128xf32> to vector<2x32xf32>
    %189 = vector.extract_strided_slice %184 {offsets = [0, 96], sizes = [2, 32], strides = [1, 1]} : vector<2x128xf32> to vector<2x32xf32>
    %190 = arith.mulf %187, %172 : vector<2x32xf32>
    %191 = arith.mulf %186, %188 : vector<2x32xf32>
    %192 = arith.addf %190, %191 : vector<2x32xf32>
    %193 = math.tanh %192 : vector<2x32xf32>
    %194 = arith.mulf %189, %193 : vector<2x32xf32>
    %c0_62 = arith.constant 0 : index
    %c256 = arith.constant 256 : index
    %195 = vector.load %arg6[%c0_62, %c256] : memref<2x512xf32, #tpu.memory_space<vmem>>, vector<2x32xf32>
    tpu.vector_store %arg6[%c0_62, %c256], %194 {strides = array<i32>} : memref<2x512xf32, #tpu.memory_space<vmem>>, vector<2x32xf32>,
    %c0_63 = arith.constant 0 : index
    %c9 = arith.constant 9 : index
    %c0_64 = arith.constant 0 : index
    %196 = vector.load %arg9[%c0_63, %c9, %c0_64] : memref<2x16x128xf32, #tpu.memory_space<vmem>>, vector<2x1x128xf32>
    %197 = vector.shape_cast %196 : vector<2x1x128xf32> to vector<2x128xf32>
    %cst_65 = arith.constant dense<0.000000e+00> : vector<2x128xf32>
    %198 = tpu.matmul %194, %13, %cst_65 {dimension_numbers = #tpu.dot_dimension_numbers<[1], [0], [0], [1], [0, 0, 1, 1], [], []>} : vector<2x32xf32>, vector<32x128xf32>, vector<2x128xf32> -> vector<2x128xf32>
    %199 = arith.addf %197, %198 : vector<2x128xf32>
    %200 = arith.negf %199 : vector<2x128xf32>
    %201 = math.exp %200 : vector<2x128xf32>
    %cst_66 = arith.constant 1.000000e+00 : f32
    %202 = vector.broadcast %cst_66 : f32 to vector<2x128xf32>
    %203 = arith.addf %202, %201 : vector<2x128xf32>
    %204 = arith.divf %202, %203 : vector<2x128xf32>
    %205 = math.tanh %199 : vector<2x128xf32>
    %206 = vector.extract_strided_slice %204 {offsets = [0, 0], sizes = [2, 32], strides = [1, 1]} : vector<2x128xf32> to vector<2x32xf32>
    %207 = vector.extract_strided_slice %204 {offsets = [0, 32], sizes = [2, 32], strides = [1, 1]} : vector<2x128xf32> to vector<2x32xf32>
    %208 = vector.extract_strided_slice %205 {offsets = [0, 64], sizes = [2, 32], strides = [1, 1]} : vector<2x128xf32> to vector<2x32xf32>
    %209 = vector.extract_strided_slice %204 {offsets = [0, 96], sizes = [2, 32], strides = [1, 1]} : vector<2x128xf32> to vector<2x32xf32>
    %210 = arith.mulf %207, %192 : vector<2x32xf32>
    %211 = arith.mulf %206, %208 : vector<2x32xf32>
    %212 = arith.addf %210, %211 : vector<2x32xf32>
    %213 = math.tanh %212 : vector<2x32xf32>
    %214 = arith.mulf %209, %213 : vector<2x32xf32>
    %c0_67 = arith.constant 0 : index
    %c288 = arith.constant 288 : index
    %215 = vector.load %arg6[%c0_67, %c288] : memref<2x512xf32, #tpu.memory_space<vmem>>, vector<2x32xf32>
    tpu.vector_store %arg6[%c0_67, %c288], %214 {strides = array<i32>} : memref<2x512xf32, #tpu.memory_space<vmem>>, vector<2x32xf32>,
    %c0_68 = arith.constant 0 : index
    %c10 = arith.constant 10 : index
    %c0_69 = arith.constant 0 : index
    %216 = vector.load %arg9[%c0_68, %c10, %c0_69] : memref<2x16x128xf32, #tpu.memory_space<vmem>>, vector<2x1x128xf32>
    %217 = vector.shape_cast %216 : vector<2x1x128xf32> to vector<2x128xf32>
    %cst_70 = arith.constant dense<0.000000e+00> : vector<2x128xf32>
    %218 = tpu.matmul %214, %13, %cst_70 {dimension_numbers = #tpu.dot_dimension_numbers<[1], [0], [0], [1], [0, 0, 1, 1], [], []>} : vector<2x32xf32>, vector<32x128xf32>, vector<2x128xf32> -> vector<2x128xf32>
    %219 = arith.addf %217, %218 : vector<2x128xf32>
    %220 = arith.negf %219 : vector<2x128xf32>
    %221 = math.exp %220 : vector<2x128xf32>
    %cst_71 = arith.constant 1.000000e+00 : f32
    %222 = vector.broadcast %cst_71 : f32 to vector<2x128xf32>
    %223 = arith.addf %222, %221 : vector<2x128xf32>
    %224 = arith.divf %222, %223 : vector<2x128xf32>
    %225 = math.tanh %219 : vector<2x128xf32>
    %226 = vector.extract_strided_slice %224 {offsets = [0, 0], sizes = [2, 32], strides = [1, 1]} : vector<2x128xf32> to vector<2x32xf32>
    %227 = vector.extract_strided_slice %224 {offsets = [0, 32], sizes = [2, 32], strides = [1, 1]} : vector<2x128xf32> to vector<2x32xf32>
    %228 = vector.extract_strided_slice %225 {offsets = [0, 64], sizes = [2, 32], strides = [1, 1]} : vector<2x128xf32> to vector<2x32xf32>
    %229 = vector.extract_strided_slice %224 {offsets = [0, 96], sizes = [2, 32], strides = [1, 1]} : vector<2x128xf32> to vector<2x32xf32>
    %230 = arith.mulf %227, %212 : vector<2x32xf32>
    %231 = arith.mulf %226, %228 : vector<2x32xf32>
    %232 = arith.addf %230, %231 : vector<2x32xf32>
    %233 = math.tanh %232 : vector<2x32xf32>
    %234 = arith.mulf %229, %233 : vector<2x32xf32>
    %c0_72 = arith.constant 0 : index
    %c320 = arith.constant 320 : index
    %235 = vector.load %arg6[%c0_72, %c320] : memref<2x512xf32, #tpu.memory_space<vmem>>, vector<2x32xf32>
    tpu.vector_store %arg6[%c0_72, %c320], %234 {strides = array<i32>} : memref<2x512xf32, #tpu.memory_space<vmem>>, vector<2x32xf32>,
    %c0_73 = arith.constant 0 : index
    %c11 = arith.constant 11 : index
    %c0_74 = arith.constant 0 : index
    %236 = vector.load %arg9[%c0_73, %c11, %c0_74] : memref<2x16x128xf32, #tpu.memory_space<vmem>>, vector<2x1x128xf32>
    %237 = vector.shape_cast %236 : vector<2x1x128xf32> to vector<2x128xf32>
    %cst_75 = arith.constant dense<0.000000e+00> : vector<2x128xf32>
    %238 = tpu.matmul %234, %13, %cst_75 {dimension_numbers = #tpu.dot_dimension_numbers<[1], [0], [0], [1], [0, 0, 1, 1], [], []>} : vector<2x32xf32>, vector<32x128xf32>, vector<2x128xf32> -> vector<2x128xf32>
    %239 = arith.addf %237, %238 : vector<2x128xf32>
    %240 = arith.negf %239 : vector<2x128xf32>
    %241 = math.exp %240 : vector<2x128xf32>
    %cst_76 = arith.constant 1.000000e+00 : f32
    %242 = vector.broadcast %cst_76 : f32 to vector<2x128xf32>
    %243 = arith.addf %242, %241 : vector<2x128xf32>
    %244 = arith.divf %242, %243 : vector<2x128xf32>
    %245 = math.tanh %239 : vector<2x128xf32>
    %246 = vector.extract_strided_slice %244 {offsets = [0, 0], sizes = [2, 32], strides = [1, 1]} : vector<2x128xf32> to vector<2x32xf32>
    %247 = vector.extract_strided_slice %244 {offsets = [0, 32], sizes = [2, 32], strides = [1, 1]} : vector<2x128xf32> to vector<2x32xf32>
    %248 = vector.extract_strided_slice %245 {offsets = [0, 64], sizes = [2, 32], strides = [1, 1]} : vector<2x128xf32> to vector<2x32xf32>
    %249 = vector.extract_strided_slice %244 {offsets = [0, 96], sizes = [2, 32], strides = [1, 1]} : vector<2x128xf32> to vector<2x32xf32>
    %250 = arith.mulf %247, %232 : vector<2x32xf32>
    %251 = arith.mulf %246, %248 : vector<2x32xf32>
    %252 = arith.addf %250, %251 : vector<2x32xf32>
    %253 = math.tanh %252 : vector<2x32xf32>
    %254 = arith.mulf %249, %253 : vector<2x32xf32>
    %c0_77 = arith.constant 0 : index
    %c352 = arith.constant 352 : index
    %255 = vector.load %arg6[%c0_77, %c352] : memref<2x512xf32, #tpu.memory_space<vmem>>, vector<2x32xf32>
    tpu.vector_store %arg6[%c0_77, %c352], %254 {strides = array<i32>} : memref<2x512xf32, #tpu.memory_space<vmem>>, vector<2x32xf32>,
    %c0_78 = arith.constant 0 : index
    %c12 = arith.constant 12 : index
    %c0_79 = arith.constant 0 : index
    %256 = vector.load %arg9[%c0_78, %c12, %c0_79] : memref<2x16x128xf32, #tpu.memory_space<vmem>>, vector<2x1x128xf32>
    %257 = vector.shape_cast %256 : vector<2x1x128xf32> to vector<2x128xf32>
    %cst_80 = arith.constant dense<0.000000e+00> : vector<2x128xf32>
    %258 = tpu.matmul %254, %13, %cst_80 {dimension_numbers = #tpu.dot_dimension_numbers<[1], [0], [0], [1], [0, 0, 1, 1], [], []>} : vector<2x32xf32>, vector<32x128xf32>, vector<2x128xf32> -> vector<2x128xf32>
    %259 = arith.addf %257, %258 : vector<2x128xf32>
    %260 = arith.negf %259 : vector<2x128xf32>
    %261 = math.exp %260 : vector<2x128xf32>
    %cst_81 = arith.constant 1.000000e+00 : f32
    %262 = vector.broadcast %cst_81 : f32 to vector<2x128xf32>
    %263 = arith.addf %262, %261 : vector<2x128xf32>
    %264 = arith.divf %262, %263 : vector<2x128xf32>
    %265 = math.tanh %259 : vector<2x128xf32>
    %266 = vector.extract_strided_slice %264 {offsets = [0, 0], sizes = [2, 32], strides = [1, 1]} : vector<2x128xf32> to vector<2x32xf32>
    %267 = vector.extract_strided_slice %264 {offsets = [0, 32], sizes = [2, 32], strides = [1, 1]} : vector<2x128xf32> to vector<2x32xf32>
    %268 = vector.extract_strided_slice %265 {offsets = [0, 64], sizes = [2, 32], strides = [1, 1]} : vector<2x128xf32> to vector<2x32xf32>
    %269 = vector.extract_strided_slice %264 {offsets = [0, 96], sizes = [2, 32], strides = [1, 1]} : vector<2x128xf32> to vector<2x32xf32>
    %270 = arith.mulf %267, %252 : vector<2x32xf32>
    %271 = arith.mulf %266, %268 : vector<2x32xf32>
    %272 = arith.addf %270, %271 : vector<2x32xf32>
    %273 = math.tanh %272 : vector<2x32xf32>
    %274 = arith.mulf %269, %273 : vector<2x32xf32>
    %c0_82 = arith.constant 0 : index
    %c384 = arith.constant 384 : index
    %275 = vector.load %arg6[%c0_82, %c384] : memref<2x512xf32, #tpu.memory_space<vmem>>, vector<2x32xf32>
    tpu.vector_store %arg6[%c0_82, %c384], %274 {strides = array<i32>} : memref<2x512xf32, #tpu.memory_space<vmem>>, vector<2x32xf32>,
    %c0_83 = arith.constant 0 : index
    %c13 = arith.constant 13 : index
    %c0_84 = arith.constant 0 : index
    %276 = vector.load %arg9[%c0_83, %c13, %c0_84] : memref<2x16x128xf32, #tpu.memory_space<vmem>>, vector<2x1x128xf32>
    %277 = vector.shape_cast %276 : vector<2x1x128xf32> to vector<2x128xf32>
    %cst_85 = arith.constant dense<0.000000e+00> : vector<2x128xf32>
    %278 = tpu.matmul %274, %13, %cst_85 {dimension_numbers = #tpu.dot_dimension_numbers<[1], [0], [0], [1], [0, 0, 1, 1], [], []>} : vector<2x32xf32>, vector<32x128xf32>, vector<2x128xf32> -> vector<2x128xf32>
    %279 = arith.addf %277, %278 : vector<2x128xf32>
    %280 = arith.negf %279 : vector<2x128xf32>
    %281 = math.exp %280 : vector<2x128xf32>
    %cst_86 = arith.constant 1.000000e+00 : f32
    %282 = vector.broadcast %cst_86 : f32 to vector<2x128xf32>
    %283 = arith.addf %282, %281 : vector<2x128xf32>
    %284 = arith.divf %282, %283 : vector<2x128xf32>
    %285 = math.tanh %279 : vector<2x128xf32>
    %286 = vector.extract_strided_slice %284 {offsets = [0, 0], sizes = [2, 32], strides = [1, 1]} : vector<2x128xf32> to vector<2x32xf32>
    %287 = vector.extract_strided_slice %284 {offsets = [0, 32], sizes = [2, 32], strides = [1, 1]} : vector<2x128xf32> to vector<2x32xf32>
    %288 = vector.extract_strided_slice %285 {offsets = [0, 64], sizes = [2, 32], strides = [1, 1]} : vector<2x128xf32> to vector<2x32xf32>
    %289 = vector.extract_strided_slice %284 {offsets = [0, 96], sizes = [2, 32], strides = [1, 1]} : vector<2x128xf32> to vector<2x32xf32>
    %290 = arith.mulf %287, %272 : vector<2x32xf32>
    %291 = arith.mulf %286, %288 : vector<2x32xf32>
    %292 = arith.addf %290, %291 : vector<2x32xf32>
    %293 = math.tanh %292 : vector<2x32xf32>
    %294 = arith.mulf %289, %293 : vector<2x32xf32>
    %c0_87 = arith.constant 0 : index
    %c416 = arith.constant 416 : index
    %295 = vector.load %arg6[%c0_87, %c416] : memref<2x512xf32, #tpu.memory_space<vmem>>, vector<2x32xf32>
    tpu.vector_store %arg6[%c0_87, %c416], %294 {strides = array<i32>} : memref<2x512xf32, #tpu.memory_space<vmem>>, vector<2x32xf32>,
    %c0_88 = arith.constant 0 : index
    %c14 = arith.constant 14 : index
    %c0_89 = arith.constant 0 : index
    %296 = vector.load %arg9[%c0_88, %c14, %c0_89] : memref<2x16x128xf32, #tpu.memory_space<vmem>>, vector<2x1x128xf32>
    %297 = vector.shape_cast %296 : vector<2x1x128xf32> to vector<2x128xf32>
    %cst_90 = arith.constant dense<0.000000e+00> : vector<2x128xf32>
    %298 = tpu.matmul %294, %13, %cst_90 {dimension_numbers = #tpu.dot_dimension_numbers<[1], [0], [0], [1], [0, 0, 1, 1], [], []>} : vector<2x32xf32>, vector<32x128xf32>, vector<2x128xf32> -> vector<2x128xf32>
    %299 = arith.addf %297, %298 : vector<2x128xf32>
    %300 = arith.negf %299 : vector<2x128xf32>
    %301 = math.exp %300 : vector<2x128xf32>
    %cst_91 = arith.constant 1.000000e+00 : f32
    %302 = vector.broadcast %cst_91 : f32 to vector<2x128xf32>
    %303 = arith.addf %302, %301 : vector<2x128xf32>
    %304 = arith.divf %302, %303 : vector<2x128xf32>
    %305 = math.tanh %299 : vector<2x128xf32>
    %306 = vector.extract_strided_slice %304 {offsets = [0, 0], sizes = [2, 32], strides = [1, 1]} : vector<2x128xf32> to vector<2x32xf32>
    %307 = vector.extract_strided_slice %304 {offsets = [0, 32], sizes = [2, 32], strides = [1, 1]} : vector<2x128xf32> to vector<2x32xf32>
    %308 = vector.extract_strided_slice %305 {offsets = [0, 64], sizes = [2, 32], strides = [1, 1]} : vector<2x128xf32> to vector<2x32xf32>
    %309 = vector.extract_strided_slice %304 {offsets = [0, 96], sizes = [2, 32], strides = [1, 1]} : vector<2x128xf32> to vector<2x32xf32>
    %310 = arith.mulf %307, %292 : vector<2x32xf32>
    %311 = arith.mulf %306, %308 : vector<2x32xf32>
    %312 = arith.addf %310, %311 : vector<2x32xf32>
    %313 = math.tanh %312 : vector<2x32xf32>
    %314 = arith.mulf %309, %313 : vector<2x32xf32>
    %c0_92 = arith.constant 0 : index
    %c448 = arith.constant 448 : index
    %315 = vector.load %arg6[%c0_92, %c448] : memref<2x512xf32, #tpu.memory_space<vmem>>, vector<2x32xf32>
    tpu.vector_store %arg6[%c0_92, %c448], %314 {strides = array<i32>} : memref<2x512xf32, #tpu.memory_space<vmem>>, vector<2x32xf32>,
    %c0_93 = arith.constant 0 : index
    %c15 = arith.constant 15 : index
    %c0_94 = arith.constant 0 : index
    %316 = vector.load %arg9[%c0_93, %c15, %c0_94] : memref<2x16x128xf32, #tpu.memory_space<vmem>>, vector<2x1x128xf32>
    %317 = vector.shape_cast %316 : vector<2x1x128xf32> to vector<2x128xf32>
    %cst_95 = arith.constant dense<0.000000e+00> : vector<2x128xf32>
    %318 = tpu.matmul %314, %13, %cst_95 {dimension_numbers = #tpu.dot_dimension_numbers<[1], [0], [0], [1], [0, 0, 1, 1], [], []>} : vector<2x32xf32>, vector<32x128xf32>, vector<2x128xf32> -> vector<2x128xf32>
    %319 = arith.addf %317, %318 : vector<2x128xf32>
    %320 = arith.negf %319 : vector<2x128xf32>
    %321 = math.exp %320 : vector<2x128xf32>
    %cst_96 = arith.constant 1.000000e+00 : f32
    %322 = vector.broadcast %cst_96 : f32 to vector<2x128xf32>
    %323 = arith.addf %322, %321 : vector<2x128xf32>
    %324 = arith.divf %322, %323 : vector<2x128xf32>
    %325 = math.tanh %319 : vector<2x128xf32>
    %326 = vector.extract_strided_slice %324 {offsets = [0, 0], sizes = [2, 32], strides = [1, 1]} : vector<2x128xf32> to vector<2x32xf32>
    %327 = vector.extract_strided_slice %324 {offsets = [0, 32], sizes = [2, 32], strides = [1, 1]} : vector<2x128xf32> to vector<2x32xf32>
    %328 = vector.extract_strided_slice %325 {offsets = [0, 64], sizes = [2, 32], strides = [1, 1]} : vector<2x128xf32> to vector<2x32xf32>
    %329 = vector.extract_strided_slice %324 {offsets = [0, 96], sizes = [2, 32], strides = [1, 1]} : vector<2x128xf32> to vector<2x32xf32>
    %330 = arith.mulf %327, %312 : vector<2x32xf32>
    %331 = arith.mulf %326, %328 : vector<2x32xf32>
    %332 = arith.addf %330, %331 : vector<2x32xf32>
    %333 = math.tanh %332 : vector<2x32xf32>
    %334 = arith.mulf %329, %333 : vector<2x32xf32>
    %c0_97 = arith.constant 0 : index
    %c480 = arith.constant 480 : index
    %335 = vector.load %arg6[%c0_97, %c480] : memref<2x512xf32, #tpu.memory_space<vmem>>, vector<2x32xf32>
    tpu.vector_store %arg6[%c0_97, %c480], %334 {strides = array<i32>} : memref<2x512xf32, #tpu.memory_space<vmem>>, vector<2x32xf32>,
    %c0_98 = arith.constant 0 : index
    %c0_99 = arith.constant 0 : index
    %336 = vector.load %arg7[%c0_98, %c0_99] : memref<2x32xf32, #tpu.memory_space<vmem>>, vector<2x32xf32>
    tpu.vector_store %arg7[%c0_98, %c0_99], %334 {strides = array<i32>} : memref<2x32xf32, #tpu.memory_space<vmem>>, vector<2x32xf32>,
    %c0_100 = arith.constant 0 : index
    %c0_101 = arith.constant 0 : index
    %337 = vector.load %arg8[%c0_100, %c0_101] : memref<2x32xf32, #tpu.memory_space<vmem>>, vector<2x32xf32>
    tpu.vector_store %arg8[%c0_100, %c0_101], %332 {strides = array<i32>} : memref<2x32xf32, #tpu.memory_space<vmem>>, vector<2x32xf32>,
    return
  }
  func.func @transform_0(%arg0: i32, %arg1: i32) -> (i32, i32, i32) {
    %c0_i32 = arith.constant 0 : i32
    %c0_i32_0 = arith.constant 0 : i32
    return %arg0, %arg1, %c0_i32 : i32, i32, i32
  }
  func.func @transform_1(%arg0: i32, %arg1: i32) -> (i32, i32) {
    %c0_i32 = arith.constant 0 : i32
    %c0_i32_0 = arith.constant 0 : i32
    %c0_i32_1 = arith.constant 0 : i32
    return %c0_i32, %c0_i32_0 : i32, i32
  }
  func.func @transform_2(%arg0: i32, %arg1: i32) -> (i32, i32) {
    %c0_i32 = arith.constant 0 : i32
    %c0_i32_0 = arith.constant 0 : i32
    %c0_i32_1 = arith.constant 0 : i32
    return %c0_i32, %c0_i32_0 : i32, i32
  }
  func.func @transform_3(%arg0: i32, %arg1: i32) -> (i32, i32) {
    %c0_i32 = arith.constant 0 : i32
    %c0_i32_0 = arith.constant 0 : i32
    %c0_i32_1 = arith.constant 0 : i32
    return %c0_i32, %c0_i32_0 : i32, i32
  }
  func.func @transform_4(%arg0: i32, %arg1: i32) -> (i32, i32) {
    %c0_i32 = arith.constant 0 : i32
    return %arg0, %arg1 : i32, i32
  }
}

</mosaic_0001>

<bundles_post_ra>
// kernel: tpu_custom_call.1
= control target key start
LH: loop header
LB: loop body
LE: loop exit
PB: predicated region body
PF: predicated region fallthrough
CT: control target
= control target key end

     0   :  { %9 = vsyncpa [#allocation6], 0  ;;  %s4095_s0 = inlined_call_operand.hbm [shape: f32[2,16,16], index: 0, kind: input, shape index: {}]   ;;  %s4096_s1 = inlined_call_operand.hbm [shape: f32[16,128], index: 1, kind: input, shape index: {}]   ;;  %s4097_s2 = inlined_call_operand.hbm [shape: f32[32,128], index: 2, kind: input, shape index: {}]   ;;  %s4098_s3 = inlined_call_operand.vmem [shape: f32[1,128], index: 3, kind: input, shape index: {}]   ;;  %s4099_s4 = inlined_call_operand.hbm [shape: f32[2,512], index: 4, kind: output, shape index: {}]  }
   0x1   :  { %10 = vsyncpa [#allocation9], 0 }
   0x2   :  { %11 = vsyncpa [#allocation7], 0  ;;  %s3561_s15 = smov [#allocation8]   ;;  %s3562_s17 = smov [#allocation5]  }
   0x3   :  { %s29_s16 = sshll.u32 %s3561_s15, 4  ;;  %s17_s18 = sshll.u32 %s3562_s17, 4  ;;  %s30_s16 = int_to_ptr.vmem [resolvable:$true] %s29_s16  ;;  %s3599_s18 = int_to_ptr.vmem [resolvable:$true] %s17_s18 }
   0x4   :  { %s3467_s21 = scalar_lea.hbm %s4096_s1, 256 }
   0x5   :  { %p3468_p0 = scmp.ne.s32.totalorder %s4096_s1, %s3467_s21  ;;  %p3471_p1 = scmp.lt.u32.totalorder %s3467_s21, %s4096_s1 }
   0x7   :  { %p3473_p2 = pnand %p3471_p1, %p3468_p0 }
   0x9   :  { %3476 = shalt.err (!%p3473_p2)
}
   0xa   :  { %s3477_s26 = scalar_lea.vmem %s30_s16, 256  ;;  %p3482_p4 = scmp.lt.s32.totalorder %s30_s16, %s30_s16 }
   0xb   :  { %p3478_p3 = scmp.ne.s32.totalorder %s30_s16, %s3477_s26  ;;  %p3483_p5 = scmp.lt.s32.totalorder %s3477_s26, %s3477_s26 }
   0xd   :  { %p3484_p6 = por %p3483_p5, %p3482_p4 }
   0xf   :  { %p3485_p7 = pnand %p3484_p6, %p3478_p3 }
  0x11   :  { %3488 = shalt.err (!%p3485_p7)
}
  0x12   :  { %s3563_s27 = smov 128   ;;  %s3564_s28 = smov 8  }
  0x13   :  { %35 = dma.hbm_to_vmem [thread:$0]  %s4096_s1, 256, %s30_s16, [#allocation9], %s3563_s27, %s3563_s27, %s3564_s28  }
  0x14   :  { %s3489_s7 = scalar_lea.hbm %s4095_s0, 512 }
  0x15   :  { %p3490_p8 = scmp.ne.s32.totalorder %s4095_s0, %s3489_s7  ;;  %p3493_p9 = scmp.lt.u32.totalorder %s3489_s7, %s4095_s0 }
  0x17   :  { %p3495_p10 = pnand %p3493_p9, %p3490_p8 }
  0x19   :  { %3498 = shalt.err (!%p3495_p10)
}
  0x1a   :  { %s3499_s12 = scalar_lea.vmem %s3599_s18, 512  ;;  %p3504_p12 = scmp.lt.s32.totalorder %s3599_s18, %s3599_s18 }
  0x1b   :  { %p3500_p11 = scmp.ne.s32.totalorder %s3599_s18, %s3499_s12  ;;  %p3505_p13 = scmp.lt.s32.totalorder %s3499_s12, %s3499_s12 }
  0x1d   :  { %p3506_p0 = por %p3505_p13, %p3504_p12 }
  0x1f   :  { %p3507_p1 = pnand %p3506_p0, %p3500_p11 }
  0x21   :  { %3510 = shalt.err (!%p3507_p1)
}
  0x22   :  { %23 = dma.hbm_to_vmem [thread:$0]  %s4095_s0, 512, %s3599_s18, [#allocation6], %s3563_s27, %s3563_s27, %s3564_s28  }
  0x23   :  { %s3565_s14 = smov [#allocation10]   ;;  %s3511_s19 = scalar_lea.hbm %s4097_s2, 512 }
  0x24   :  { %s41_s15 = sshll.u32 %s3565_s14, 4  ;;  %p3512_p2 = scmp.ne.s32.totalorder %s4097_s2, %s3511_s19  ;;  %s42_s15 = int_to_ptr.vmem [resolvable:$true] %s41_s15 }
  0x25   :  { %p3515_p3 = scmp.lt.u32.totalorder %s3511_s19, %s4097_s2 }
  0x27   :  { %p3517_p4 = pnand %p3515_p3, %p3512_p2 }
  0x29   :  { %3520 = shalt.err (!%p3517_p4)
}
  0x2a   :  { %s3521_s24 = scalar_lea.vmem %s42_s15, 512  ;;  %p3526_p6 = scmp.lt.s32.totalorder %s42_s15, %s42_s15 }
  0x2b   :  { %p3522_p5 = scmp.ne.s32.totalorder %s42_s15, %s3521_s24  ;;  %p3527_p7 = scmp.lt.s32.totalorder %s3521_s24, %s3521_s24 }
  0x2d   :  { %p3528_p8 = por %p3527_p7, %p3526_p6 }
  0x2f   :  { %p3529_p9 = pnand %p3528_p8, %p3522_p5 }
  0x31   :  { %3532 = shalt.err (!%p3529_p9)
}
  0x32   :  { %47 = dma.hbm_to_vmem [thread:$0]  %s4097_s2, 512, %s42_s15, [#allocation9], %s3563_s27, %s3563_s27, %s3564_s28  }
  0x33   :  { %3555 = dma.done.wait [#allocation6], 512  }
  0x34   :  { %3556 = vsyncadd [#allocation6], 4294966784 }
  0x35   :  { %3557 = dma.done.wait [#allocation9], 768  }
  0x36   :  { %3558 = vsyncadd [#allocation9], 4294966528  ;;  %v3566_v0 = vmov 0.0|0.0   ;;  %vm3567_vm0 = vmmov 0   ;;  %v3568_v1 = vmov 0.0   ;;  %vm63_vm1 = vcmask 254976  }
  0x37   :  { %3102 = vmatprep.subr.bf16.mxu1 %v3566_v0  ;;  %2930 = vmatprep.mubr.msk.f32.mxu1 %vm3567_vm0, %v3568_v1  ;;  %64 = vst.msk [vmem:[#allocation2] sm:$0x3] %vm63_vm1, %v3568_v1  ;;  %65 = vst.msk [vmem:[#allocation3] sm:$0x3] %vm63_vm1, %v3568_v1  ;;  %vm72_vm2 = vcmask 130048   ;;  %v70_v2 = vld [vmem:[#allocation8] sm:$0xff]  ;;  %v334_v60 = vlaneseq }
  0x38   :  { %v71_v3 = vld [vmem:[#allocation8 + $0x8] sm:$0xff]  ;;  %v66_v4 = vld [vmem:[#allocation5] sm:$0xff]  ;;  %v185_v6 = vld [vmem:[#allocation10] sm:$0xff]  ;;  %s3569_s2 = smov 32   ;;  %vm193_vm3 = vcmask 261120   ;;  %vm350_vm4 = vcmask 1041409  }
  0x39   :  { %v3098_v5 = vpack.c.bf16 %v71_v3, %v70_v2  ;;  %2916 = vmatprep.mubr.msk.f32.mxu0 %vm72_vm2, %v66_v4  ;;  %v186_v7 = vld [vmem:[#allocation10 + $0x8] sm:$0xff]  ;;  %v187_v8 = vld [vmem:[#allocation10 + $0x10] sm:$0xff]  ;;  %v188_v10 = vld [vmem:[#allocation10 + $0x18] sm:$0xff]  ;;  %v3571_v58 = vmov 1983009808   ;;  %v335_v62 = vshrl.u32 %v334_v60, 7 }
  0x3a   :  { %v3659_v9 = vpack.c.bf16 %v186_v7, %v185_v6  ;;  %v67_v12 = vld [vmem:[#allocation5 + $0x8] sm:$0xff]  ;;  %v68_v14 = vld [vmem:[#allocation5 + $0x10] sm:$0xff]  ;;  %v3662_v15 = vpack.c.bf16 %v188_v10, %v187_v8  ;;  %v69_v16 = vld [vmem:[#allocation5 + $0x18] sm:$0xff]  ;;  %v332_v59 = vunpack.c.l.s4 %v3571_v58  ;;  %vm352_vm5 = vcmask 1043459   ;;  %s3572_s27 = smov 96   ;;  %s3573_s28 = smov [#allocation11]  }
  0x3b   :  { %3099 = vmatprep.subr.bf16.mxu0 %v3098_v5  ;;  %v2777_v18 = vld [vmem:[%s4098_s3] ss:$0 sm:$0xff]  ;;  %s3570_s3 = smov 64   ;;  %vm354_vm6 = vcmask 1045509   ;;  %vm356_vm7 = vcmask 1047559   ;;  %vm521_vm8 = vcmask 517376  }
  0x3c   :  { %3101 = vmatpush3.bf16.msra.mxu0 %v3098_v5  ;;  %3104 = vmatpush3.bf16.msra.mxu1 %v3659_v9  ;;  %v333_v61 = vunpack.c.0.s8 %v332_v59  ;;  %vm681_vm9 = vcmask 779776   ;;  %vm839_vm10 = vcmask 1042176   ;;  %s2763_s29 = sshll.u32 %s3573_s28, 4  ;;  %s2764_s29 = int_to_ptr.vmem [resolvable:$true] %s2763_s29 }
  0x3d   :  { %3108 = vmatprep.subr.bf16.mxu0 %v3566_v0  ;;  %3105 = vmatprep.subr.bf16.mxu1 %v3566_v0  ;;  %s3533_s30 = scalar_lea.vmem %s2764_s29, 128  ;;  %p3538_p11 = scmp.lt.s32.totalorder %s2764_s29, %s2764_s29 }
  0x3e   :  { %v190_v11 = vld [vmem:[#allocation3] sm:$0x3]  ;;  %v189_v17 = vld [vmem:[#allocation2] sm:$0x3]  ;;  %v3701_v63 = vsub.s32 %v333_v61, %v335_v62  ;;  %p3534_p10 = scmp.ne.s32.totalorder %s2764_s29, %s3533_s30  ;;  %p3539_p12 = scmp.lt.s32.totalorder %s3533_s30, %s3533_s30 }
  0x3f   :  { %v288_v13 = vrot.slane %v190_v11, 1  ;;  %2917 = vmatmul.mubr.msk.f32.vlgmr.msra.gmra.mrb[0].mxu0 %vm72_vm2, %v67_v12 }
  0x40   :  { %2919 = vmatprep.mubr.msk.f32.mxu0 %vm72_vm2, %v68_v14  ;;  %3110 = vmatpush3.bf16.msra.mxu0 %v3659_v9  ;;  %p3540_p13 = por %p3539_p12, %p3538_p11 }
  0x41   :  { %291 = vrot.lane.b32.xlu1 %v288_v13, %s3569_s2  ;;  %3107 = vmatpush3.bf16.msra.mxu1 %v3662_v15 }
  0x42   :  { %3111 = vmatprep.subr.bf16.mxu0 %v3566_v0  ;;  %3114 = vmatprep.subr.bf16.mxu1 %v3566_v0  ;;  %p3541_p0 = pnand %p3540_p13, %p3534_p10 }
  0x43   :  { %2920 = vmatmul.mubr.msk.f32.gmra.mrb[2].mxu0 %vm72_vm2, %v69_v16 }
  0x44   :  { %2931 = vmatmul.mubr.msk.f32.vlgmr.msra.gmra.mrb[0].mxu1 %vm193_vm3, %v189_v17  ;;  %3113 = vmatpush3.bf16.msra.mxu0 %v3662_v15 }
  0x45   :  { %289 = vrot.lane.b32.xlu1 %v190_v11, %s3569_s2  ;;  %2941 = vmatprep.mubr.msk.f32.mxu0 %vm3567_vm0, %v3568_v1 }
  0x46   :  { %3116 = vmatpush3.bf16.msra.mxu1 %v3659_v9  ;;  %2952 = vmatprep.mubr.msk.f32.mxu1 %vm3567_vm0, %v3568_v1 }
  0x47   :  { %3117 = vmatprep.subr.bf16.mxu1 %v3566_v0  ;;  %3120 = vmatprep.subr.bf16.mxu0 %v3566_v0 }
  0x4a   :  { %3119 = vmatpush3.bf16.msra.mxu1 %v3662_v15 }
  0x4b   :  { %3126 = vmatprep.subr.bf16.mxu1 %v3566_v0 }
  0xb3   :  { %v292_v48 = vpop.permute.xlu1 %291 }
  0xb7   :  { %v290_v50 = vpop.permute.xlu1 %289 }
 0x112   :  { %v2918_v19 = vpop.f32.mrb[0].mxu0 }
 0x113   :  { %v178_v20 = vadd.f32 %v2918_v19, %v2777_v18  ;;  %v151_v21 = vpop.f32.mrb[1].mxu0 }
 0x114   :  { %v177_v22 = vadd.f32 %v2777_v18, %v151_v21 }
 0x115   :  { %182 = vst [vmem:[#allocation4 + $0x8] sm:$0xff] %v178_v20 }
 0x116   :  { %181 = vst [vmem:[#allocation4] sm:$0xff] %v177_v22  ;;  %v2921_v23 = vpop.f32.mrb[2].mxu0 }
 0x117   :  { %v180_v24 = vadd.f32 %v2921_v23, %v2777_v18  ;;  %v161_v25 = vpop.f32.mrb[3].mxu0  ;;  %v263_v26 = vpop.f32.mrb[0].mxu1 }
 0x118   :  { %v179_v27 = vadd.f32 %v2777_v18, %v161_v25  ;;  %v2932_v28 = vpop.f32.mrb[1].mxu1  ;;  %v268_v29 = vrot.slane %v263_v26, 1 }
 0x119   :  { %184 = vst [vmem:[#allocation4 + $0x18] sm:$0xff] %v180_v24 }
 0x11a   :  { %183 = vst [vmem:[#allocation4 + $0x10] sm:$0xff] %v179_v27 }
 0x11d   :  { %v191_v30 = vld [vmem:[#allocation4] sm:$0x1]  ;;  %v363_v18 = vld [vmem:[#allocation4 + $0x1] sm:$0x1]  ;;  %v523_v61 = vld [vmem:[#allocation4 + $0x2] sm:$0x1] }
 0x11e   :  { %v271_v33 = vadd.f32 %v263_v26, %v191_v30 }
 0x120   :  { %v2779_v37 = vmul.f32 -1.442695, %v271_v33 }
 0x121   :  { %v192_v31 = vld [vmem:[#allocation4 + $0x10] sm:$0x1]  ;;  %v364_v23 = vld [vmem:[#allocation4 + $0x11] sm:$0x1] }
 0x122   :  { %v272_v32 = vadd.f32 %v268_v29, %v192_v31 }
 0x124   :  { %3211 = vtanh.f32 %v272_v32  ;;  %v2780_v36 = vmul.f32 -1.442695, %v272_v32 }
 0x125   :  { %3213 = vtanh.f32 %v271_v33 }
 0x126   :  { %3215 = vpow2.f32 %v2780_v36 }
 0x127   :  { %3217 = vpow2.f32 %v2779_v37 }
 0x12e   :  { %v3212_v34 = vpop.eup %3211 }
 0x12f   :  { %301 = vrot.lane.b32.xlu0 %v3212_v34, %s3570_s3  ;;  %v3214_v35 = vpop.eup %3213 }
 0x130   :  { %v3216_v38 = vpop.eup %3215 }
 0x131   :  { %v280_v39 = vadd.f32 1.0, %v3216_v38  ;;  %v3218_v40 = vpop.eup %3217 }
 0x132   :  { %v279_v41 = vadd.f32 1.0, %v3218_v40 }
 0x133   :  { %299 = vrot.lane.b32.xlu0 %v3214_v35, %s3570_s3  ;;  %3219 = vrcp.f32 %v280_v39 }
 0x134   :  { %3221 = vrcp.f32 %v279_v41 }
 0x13d   :  { %v3220_v42 = vpop.eup %3219 }
 0x13e   :  { %v3222_v45 = vpop.eup %3221  ;;  %v296_v49 = vmul.f32 %v3220_v42, %v292_v48 }
 0x13f   :  { %v295_v53 = vmul.f32 %v3222_v45, %v290_v50 }
 0x1a1   :  { %v302_v43 = vpop.permute.xlu0 %301 }
 0x1a2   :  { %v306_v44 = vmul.f32 %v3220_v42, %v302_v43 }
 0x1a4   :  { %311 = vrot.lane.b32.xlu0 %v306_v44, %s3569_s2 }
 0x1a5   :  { %v300_v46 = vpop.permute.xlu0 %299 }
 0x1a6   :  { %v305_v47 = vmul.f32 %v3222_v45, %v300_v46 }
 0x1a8   :  { %309 = vrot.lane.b32.xlu1 %v305_v47, %s3569_s2 }
 0x216   :  { %v312_v51 = vpop.permute.xlu0 %311 }
 0x217   :  { %v3693_v52 = vadd.f32 %v312_v51, %v296_v49 }
 0x219   :  { %3223 = vtanh.f32 %v3693_v52 }
 0x21a   :  { %v310_v54 = vpop.permute.xlu1 %309 }
 0x21b   :  { %v3696_v55 = vadd.f32 %v310_v54, %v295_v53 }
 0x21d   :  { %3225 = vtanh.f32 %v3696_v55 }
 0x223   :  { %v3224_v56 = vpop.eup %3223 }
 0x224   :  { %323 = vrot.lane.b32.xlu0 %v3224_v56, %s3570_s3 }
 0x227   :  { %v3226_v57 = vpop.eup %3225 }
 0x228   :  { %321 = vrot.lane.b32.xlu1 %v3226_v57, %s3570_s3 }
 0x296   :  { %v324_v2 = vpop.permute.xlu0 %323 }
 0x297   :  { %v328_v3 = vmul.f32 %v3220_v42, %v324_v2 }
 0x299   :  { %v344_v4 = vrot.slane %v328_v3, %v3701_v63  ;;  %v365_v6 = vrot.slane %v328_v3, 7 }
 0x29a   :  { %v322_v5 = vpop.permute.xlu1 %321 }
 0x29b   :  { %v327_v7 = vmul.f32 %v3222_v45, %v322_v5  ;;  %v349_v8 = vrot.slane %v344_v4, 7  ;;  %v524_v5 = vld [vmem:[#allocation4 + $0x12] sm:$0x1] }
 0x29d   :  { %v337_v10 = vrot.slane %v327_v7, %v3701_v63  ;;  %v366_v11 = vsel %vm350_vm4, %v365_v6, %v327_v7 }
 0x29e   :  { %367 = vrot.lane.b32.xlu0 %v366_v11, %s3569_s2 }
 0x29f   :  { %v351_v12 = vsel %vm350_vm4, %v349_v8, %v337_v10 }
 0x2a0   :  { %v353_v13 = vsel %vm352_vm5, %v349_v8, %v351_v12 }
 0x2a1   :  { %v355_v14 = vsel %vm354_vm6, %v349_v8, %v353_v13 }
 0x2a2   :  { %v3711_v16 = vsel %vm356_vm7, %v349_v8, %v355_v14 }
 0x310   :  { %v368_v17 = vpop.permute.xlu0 %367 }
 0x311   :  { %2942 = vmatmul.mubr.msk.f32.vlgmr.msra.gmra.mrb[4].mxu0 %vm193_vm3, %v368_v17 }
 0x312   :  { %3122 = vmatpush3.bf16.msra.mxu0 %v3659_v9  ;;  %2963 = vmatprep.mubr.msk.f32.mxu0 %vm3567_vm0, %v3568_v1 }
 0x313   :  { %3123 = vmatprep.subr.bf16.mxu0 %v3566_v0 }
 0x316   :  { %3125 = vmatpush3.bf16.msra.mxu0 %v3662_v15 }
 0x317   :  { %3132 = vmatprep.subr.bf16.mxu0 %v3566_v0 }
 0x3e4   :  { %v437_v19 = vpop.f32.mrb[4].mxu0 }
 0x3e5   :  { %v442_v20 = vrot.slane %v437_v19, 1  ;;  %v445_v21 = vadd.f32 %v437_v19, %v363_v18  ;;  %v2943_v22 = vpop.f32.mrb[5].mxu0 }
 0x3e7   :  { %v446_v24 = vadd.f32 %v442_v20, %v364_v23  ;;  %3227 = vtanh.f32 %v445_v21  ;;  %v2782_v27 = vmul.f32 -1.442695, %v445_v21 }
 0x3e9   :  { %3229 = vtanh.f32 %v446_v24  ;;  %v2783_v28 = vmul.f32 -1.442695, %v446_v24 }
 0x3ea   :  { %3231 = vpow2.f32 %v2782_v27 }
 0x3eb   :  { %3233 = vpow2.f32 %v2783_v28 }
 0x3f1   :  { %v3228_v25 = vpop.eup %3227 }
 0x3f2   :  { %465 = vrot.lane.b32.xlu0 %v3228_v25, %s3570_s3 }
 0x3f3   :  { %v3230_v26 = vpop.eup %3229 }
 0x3f4   :  { %467 = vrot.lane.b32.xlu1 %v3230_v26, %s3570_s3  ;;  %v3232_v29 = vpop.eup %3231 }
 0x3f5   :  { %v3234_v30 = vpop.eup %3233  ;;  %v453_v31 = vadd.f32 1.0, %v3232_v29 }
 0x3f6   :  { %v454_v32 = vadd.f32 1.0, %v3234_v30 }
 0x3f7   :  { %3235 = vrcp.f32 %v453_v31 }
 0x3f8   :  { %3237 = vrcp.f32 %v454_v32 }
 0x401   :  { %v3236_v33 = vpop.eup %3235 }
 0x402   :  { %v3238_v36 = vpop.eup %3237  ;;  %v461_v39 = vmul.f32 %v3236_v33, %v3696_v55 }
 0x403   :  { %v462_v42 = vmul.f32 %v3238_v36, %v3693_v52 }
 0x464   :  { %v466_v34 = vpop.permute.xlu0 %465 }
 0x465   :  { %v471_v35 = vmul.f32 %v3236_v33, %v466_v34 }
 0x466   :  { %v468_v37 = vpop.permute.xlu1 %467 }
 0x467   :  { %475 = vrot.lane.b32.xlu0 %v471_v35, %s3569_s2  ;;  %v472_v38 = vmul.f32 %v3238_v36, %v468_v37 }
 0x469   :  { %477 = vrot.lane.b32.xlu1 %v472_v38, %s3569_s2 }
 0x4d9   :  { %v476_v40 = vpop.permute.xlu0 %475 }
 0x4da   :  { %v481_v41 = vadd.f32 %v476_v40, %v461_v39 }
 0x4db   :  { %v478_v43 = vpop.permute.xlu1 %477 }
 0x4dc   :  { %3239 = vtanh.f32 %v481_v41  ;;  %v482_v44 = vadd.f32 %v478_v43, %v462_v42 }
 0x4de   :  { %3241 = vtanh.f32 %v482_v44 }
 0x4e6   :  { %v3240_v45 = vpop.eup %3239 }
 0x4e7   :  { %487 = vrot.lane.b32.xlu0 %v3240_v45, %s3570_s3 }
 0x4e8   :  { %v3242_v46 = vpop.eup %3241 }
 0x4e9   :  { %489 = vrot.lane.b32.xlu1 %v3242_v46, %s3570_s3  ;;  %v683_v46 = vld [vmem:[#allocation4 + $0x3] sm:$0x1] }
 0x559   :  { %v488_v47 = vpop.permute.xlu0 %487 }
 0x55a   :  { %v493_v49 = vmul.f32 %v3236_v33, %v488_v47 }
 0x55b   :  { %v490_v48 = vpop.permute.xlu1 %489 }
 0x55c   :  { %v494_v50 = vmul.f32 %v3238_v36, %v490_v48  ;;  %v503_v54 = vrot.slane %v493_v49, %v3701_v63 }
 0x55e   :  { %v510_v51 = vrot.slane %v494_v50, %v3701_v63  ;;  %v525_v53 = vrot.slane %v494_v50, 7 }
 0x560   :  { %v513_v52 = vrot.slane %v510_v51, 7  ;;  %v526_v55 = vsel %vm350_vm4, %v525_v53, %v493_v49  ;;  %v684_v51 = vld [vmem:[#allocation4 + $0x13] sm:$0x1] }
 0x561   :  { %527 = vrot.lane.b32.xlu1 %v526_v55, %s3569_s2 }
 0x562   :  { %v514_v56 = vsel %vm350_vm4, %v513_v52, %v503_v54 }
 0x563   :  { %v515_v57 = vsel %vm352_vm5, %v513_v52, %v514_v56 }
 0x564   :  { %v516_v58 = vsel %vm354_vm6, %v513_v52, %v515_v57 }
 0x565   :  { %v3736_v59 = vsel %vm356_vm7, %v513_v52, %v516_v58 }
 0x5d3   :  { %v528_v60 = vpop.permute.xlu1 %527 }
 0x5d4   :  { %2953 = vmatmul.mubr.msk.f32.vlgmr.msra.gmra.mrb[2].mxu1 %vm193_vm3, %v528_v60 }
 0x5d5   :  { %3128 = vmatpush3.bf16.msra.mxu1 %v3659_v9  ;;  %2974 = vmatprep.mubr.msk.f32.mxu1 %vm3567_vm0, %v3568_v1 }
 0x5d6   :  { %3129 = vmatprep.subr.bf16.mxu1 %v3566_v0 }
 0x5d9   :  { %3131 = vmatpush3.bf16.msra.mxu1 %v3662_v15 }
 0x5da   :  { %3138 = vmatprep.subr.bf16.mxu1 %v3566_v0 }
 0x6a7   :  { %v597_v62 = vpop.f32.mrb[2].mxu1 }
 0x6a8   :  { %v602_v2 = vrot.slane %v597_v62, 1  ;;  %v605_v3 = vadd.f32 %v597_v62, %v523_v61  ;;  %v2954_v4 = vpop.f32.mrb[3].mxu1 }
 0x6aa   :  { %v606_v6 = vadd.f32 %v602_v2, %v524_v5  ;;  %3243 = vtanh.f32 %v605_v3  ;;  %v2785_v10 = vmul.f32 -1.442695, %v605_v3 }
 0x6ac   :  { %3245 = vtanh.f32 %v606_v6  ;;  %v2786_v11 = vmul.f32 -1.442695, %v606_v6 }
 0x6ad   :  { %3247 = vpow2.f32 %v2785_v10 }
 0x6ae   :  { %3249 = vpow2.f32 %v2786_v11 }
 0x6b4   :  { %v3244_v7 = vpop.eup %3243 }
 0x6b5   :  { %625 = vrot.lane.b32.xlu1 %v3244_v7, %s3570_s3 }
 0x6b6   :  { %v3246_v8 = vpop.eup %3245 }
 0x6b7   :  { %627 = vrot.lane.b32.xlu0 %v3246_v8, %s3570_s3  ;;  %v3248_v12 = vpop.eup %3247 }
 0x6b8   :  { %v3250_v13 = vpop.eup %3249  ;;  %v613_v14 = vadd.f32 1.0, %v3248_v12 }
 0x6b9   :  { %v614_v17 = vadd.f32 1.0, %v3250_v13 }
 0x6ba   :  { %3251 = vrcp.f32 %v613_v14 }
 0x6bb   :  { %3253 = vrcp.f32 %v614_v17 }
 0x6c4   :  { %v3252_v18 = vpop.eup %3251 }
 0x6c5   :  { %v3254_v21 = vpop.eup %3253  ;;  %v621_v24 = vmul.f32 %v3252_v18, %v481_v41 }
 0x6c6   :  { %v622_v27 = vmul.f32 %v3254_v21, %v482_v44 }
 0x727   :  { %v626_v19 = vpop.permute.xlu1 %625 }
 0x728   :  { %v631_v20 = vmul.f32 %v3252_v18, %v626_v19 }
 0x729   :  { %v628_v22 = vpop.permute.xlu0 %627 }
 0x72a   :  { %635 = vrot.lane.b32.xlu1 %v631_v20, %s3569_s2  ;;  %v632_v23 = vmul.f32 %v3254_v21, %v628_v22 }
 0x72c   :  { %637 = vrot.lane.b32.xlu0 %v632_v23, %s3569_s2 }
 0x79c   :  { %v636_v25 = vpop.permute.xlu1 %635 }
 0x79d   :  { %v641_v26 = vadd.f32 %v636_v25, %v621_v24 }
 0x79e   :  { %v638_v28 = vpop.permute.xlu0 %637 }
 0x79f   :  { %3255 = vtanh.f32 %v641_v26  ;;  %v642_v29 = vadd.f32 %v638_v28, %v622_v27 }
 0x7a1   :  { %3257 = vtanh.f32 %v642_v29 }
 0x7a9   :  { %v3256_v30 = vpop.eup %3255 }
 0x7aa   :  { %647 = vrot.lane.b32.xlu1 %v3256_v30, %s3570_s3 }
 0x7ab   :  { %v3258_v31 = vpop.eup %3257 }
 0x7ac   :  { %649 = vrot.lane.b32.xlu0 %v3258_v31, %s3570_s3 }
 0x81c   :  { %v648_v32 = vpop.permute.xlu1 %647 }
 0x81d   :  { %v653_v34 = vmul.f32 %v3252_v18, %v648_v32  ;;  %v841_v32 = vld [vmem:[#allocation4 + $0x4] sm:$0x1] }
 0x81e   :  { %v650_v33 = vpop.permute.xlu0 %649 }
 0x81f   :  { %v654_v35 = vmul.f32 %v3254_v21, %v650_v33  ;;  %v663_v38 = vrot.slane %v653_v34, %v3701_v63 }
 0x821   :  { %v670_v36 = vrot.slane %v654_v35, %v3701_v63  ;;  %v685_v37 = vrot.slane %v654_v35, 7 }
 0x823   :  { %v673_v39 = vrot.slane %v670_v36, 7  ;;  %v686_v40 = vsel %vm350_vm4, %v685_v37, %v653_v34  ;;  %v842_v37 = vld [vmem:[#allocation4 + $0x14] sm:$0x1] }
 0x824   :  { %687 = vrot.lane.b32.xlu0 %v686_v40, %s3569_s2 }
 0x825   :  { %v674_v41 = vsel %vm350_vm4, %v673_v39, %v663_v38 }
 0x826   :  { %v675_v42 = vsel %vm352_vm5, %v673_v39, %v674_v41 }
 0x827   :  { %v676_v43 = vsel %vm354_vm6, %v673_v39, %v675_v42 }
 0x828   :  { %v3759_v44 = vsel %vm356_vm7, %v673_v39, %v676_v43 }
 0x896   :  { %v688_v45 = vpop.permute.xlu0 %687 }
 0x897   :  { %2964 = vmatmul.mubr.msk.f32.vlgmr.msra.gmra.mrb[6].mxu0 %vm193_vm3, %v688_v45 }
 0x898   :  { %3134 = vmatpush3.bf16.msra.mxu0 %v3659_v9  ;;  %2985 = vmatprep.mubr.msk.f32.mxu0 %vm3567_vm0, %v3568_v1 }
 0x899   :  { %3135 = vmatprep.subr.bf16.mxu0 %v3566_v0 }
 0x89c   :  { %3137 = vmatpush3.bf16.msra.mxu0 %v3662_v15 }
 0x89d   :  { %3144 = vmatprep.subr.bf16.mxu0 %v3566_v0 }
 0x96a   :  { %v757_v47 = vpop.f32.mrb[6].mxu0 }
 0x96b   :  { %v762_v48 = vrot.slane %v757_v47, 1  ;;  %v765_v49 = vadd.f32 %v757_v47, %v683_v46  ;;  %v2965_v50 = vpop.f32.mrb[7].mxu0 }
 0x96d   :  { %v766_v53 = vadd.f32 %v762_v48, %v684_v51  ;;  %3259 = vtanh.f32 %v765_v49  ;;  %v2788_v55 = vmul.f32 -1.442695, %v765_v49 }
 0x96f   :  { %3261 = vtanh.f32 %v766_v53  ;;  %v2789_v56 = vmul.f32 -1.442695, %v766_v53 }
 0x970   :  { %3263 = vpow2.f32 %v2788_v55 }
 0x971   :  { %3265 = vpow2.f32 %v2789_v56 }
 0x977   :  { %v3260_v54 = vpop.eup %3259 }
 0x978   :  { %785 = vrot.lane.b32.xlu0 %v3260_v54, %s3570_s3 }
 0x979   :  { %v3262_v52 = vpop.eup %3261 }
 0x97a   :  { %787 = vrot.lane.b32.xlu1 %v3262_v52, %s3570_s3  ;;  %v3264_v57 = vpop.eup %3263 }
 0x97b   :  { %v3266_v58 = vpop.eup %3265  ;;  %v773_v60 = vadd.f32 1.0, %v3264_v57 }
 0x97c   :  { %v774_v61 = vadd.f32 1.0, %v3266_v58 }
 0x97d   :  { %3267 = vrcp.f32 %v773_v60 }
 0x97e   :  { %3269 = vrcp.f32 %v774_v61 }
 0x987   :  { %v3268_v62 = vpop.eup %3267 }
 0x988   :  { %v3270_v4 = vpop.eup %3269  ;;  %v781_v7 = vmul.f32 %v3268_v62, %v641_v26 }
 0x989   :  { %v782_v11 = vmul.f32 %v3270_v4, %v642_v29 }
 0x9ea   :  { %v786_v2 = vpop.permute.xlu0 %785 }
 0x9eb   :  { %v791_v3 = vmul.f32 %v3268_v62, %v786_v2 }
 0x9ec   :  { %v788_v5 = vpop.permute.xlu1 %787 }
 0x9ed   :  { %795 = vrot.lane.b32.xlu0 %v791_v3, %s3569_s2  ;;  %v792_v6 = vmul.f32 %v3270_v4, %v788_v5 }
 0x9ef   :  { %797 = vrot.lane.b32.xlu1 %v792_v6, %s3569_s2 }
 0xa5f   :  { %v796_v8 = vpop.permute.xlu0 %795 }
 0xa60   :  { %v801_v10 = vadd.f32 %v796_v8, %v781_v7 }
 0xa61   :  { %v798_v12 = vpop.permute.xlu1 %797 }
 0xa62   :  { %3271 = vtanh.f32 %v801_v10  ;;  %v802_v13 = vadd.f32 %v798_v12, %v782_v11 }
 0xa64   :  { %3273 = vtanh.f32 %v802_v13 }
 0xa6c   :  { %v3272_v14 = vpop.eup %3271 }
 0xa6d   :  { %807 = vrot.lane.b32.xlu0 %v3272_v14, %s3570_s3 }
 0xa6e   :  { %v3274_v17 = vpop.eup %3273 }
 0xa6f   :  { %809 = vrot.lane.b32.xlu1 %v3274_v17, %s3570_s3 }
 0xadf   :  { %v808_v18 = vpop.permute.xlu0 %807 }
 0xae0   :  { %v813_v20 = vmul.f32 %v3268_v62, %v808_v18 }
 0xae1   :  { %v810_v19 = vpop.permute.xlu1 %809 }
 0xae2   :  { %v814_v21 = vmul.f32 %v3270_v4, %v810_v19  ;;  %v823_v24 = vrot.slane %v813_v20, %v3701_v63  ;;  %v1000_v19 = vld [vmem:[#allocation4 + $0x5] sm:$0x1] }
 0xae4   :  { %v830_v22 = vrot.slane %v814_v21, %v3701_v63  ;;  %v843_v23 = vrot.slane %v814_v21, 7 }
 0xae6   :  { %v833_v25 = vrot.slane %v830_v22, 7  ;;  %v844_v26 = vsel %vm350_vm4, %v843_v23, %v813_v20 }
 0xae7   :  { %845 = vrot.lane.b32.xlu1 %v844_v26, %s3569_s2 }
 0xae8   :  { %v834_v27 = vsel %vm350_vm4, %v833_v25, %v823_v24  ;;  %v1001_v24 = vld [vmem:[#allocation4 + $0x15] sm:$0x1] }
 0xae9   :  { %v835_v28 = vsel %vm352_vm5, %v833_v25, %v834_v27 }
 0xaea   :  { %v836_v29 = vsel %vm354_vm6, %v833_v25, %v835_v28 }
 0xaeb   :  { %v3782_v30 = vsel %vm356_vm7, %v833_v25, %v836_v29 }
 0xb59   :  { %v846_v31 = vpop.permute.xlu1 %845 }
 0xb5a   :  { %2975 = vmatmul.mubr.msk.f32.vlgmr.msra.gmra.mrb[4].mxu1 %vm193_vm3, %v846_v31 }
 0xb5b   :  { %3140 = vmatpush3.bf16.msra.mxu1 %v3659_v9  ;;  %2996 = vmatprep.mubr.msk.f32.mxu1 %vm3567_vm0, %v3568_v1 }
 0xb5c   :  { %3141 = vmatprep.subr.bf16.mxu1 %v3566_v0 }
 0xb5f   :  { %3143 = vmatpush3.bf16.msra.mxu1 %v3662_v15 }
 0xb60   :  { %3150 = vmatprep.subr.bf16.mxu1 %v3566_v0 }
 0xc2d   :  { %v915_v33 = vpop.f32.mrb[4].mxu1 }
 0xc2e   :  { %v920_v34 = vrot.slane %v915_v33, 1  ;;  %v923_v35 = vadd.f32 %v915_v33, %v841_v32  ;;  %v2976_v36 = vpop.f32.mrb[5].mxu1 }
 0xc30   :  { %v924_v38 = vadd.f32 %v920_v34, %v842_v37  ;;  %3275 = vtanh.f32 %v923_v35  ;;  %v2791_v41 = vmul.f32 -1.442695, %v923_v35 }
 0xc32   :  { %3277 = vtanh.f32 %v924_v38  ;;  %v2792_v42 = vmul.f32 -1.442695, %v924_v38 }
 0xc33   :  { %3279 = vpow2.f32 %v2791_v41 }
 0xc34   :  { %3281 = vpow2.f32 %v2792_v42 }
 0xc3a   :  { %v3276_v39 = vpop.eup %3275 }
 0xc3b   :  { %943 = vrot.lane.b32.xlu1 %v3276_v39, %s3570_s3 }
 0xc3c   :  { %v3278_v40 = vpop.eup %3277 }
 0xc3d   :  { %945 = vrot.lane.b32.xlu0 %v3278_v40, %s3570_s3  ;;  %v3280_v43 = vpop.eup %3279 }
 0xc3e   :  { %v3282_v45 = vpop.eup %3281  ;;  %v931_v46 = vadd.f32 1.0, %v3280_v43 }
 0xc3f   :  { %v932_v47 = vadd.f32 1.0, %v3282_v45 }
 0xc40   :  { %3283 = vrcp.f32 %v931_v46 }
 0xc41   :  { %3285 = vrcp.f32 %v932_v47 }
 0xc4a   :  { %v3284_v48 = vpop.eup %3283 }
 0xc4b   :  { %v3286_v51 = vpop.eup %3285  ;;  %v939_v52 = vmul.f32 %v3284_v48, %v801_v10 }
 0xc4c   :  { %v940_v57 = vmul.f32 %v3286_v51, %v802_v13 }
 0xcad   :  { %v944_v49 = vpop.permute.xlu1 %943 }
 0xcae   :  { %v949_v50 = vmul.f32 %v3284_v48, %v944_v49 }
 0xcaf   :  { %v946_v53 = vpop.permute.xlu0 %945 }
 0xcb0   :  { %953 = vrot.lane.b32.xlu1 %v949_v50, %s3569_s2  ;;  %v950_v54 = vmul.f32 %v3286_v51, %v946_v53 }
 0xcb2   :  { %955 = vrot.lane.b32.xlu0 %v950_v54, %s3569_s2 }
 0xd22   :  { %v954_v55 = vpop.permute.xlu1 %953 }
 0xd23   :  { %v959_v56 = vadd.f32 %v954_v55, %v939_v52 }
 0xd24   :  { %v956_v58 = vpop.permute.xlu0 %955 }
 0xd25   :  { %3287 = vtanh.f32 %v959_v56  ;;  %v960_v60 = vadd.f32 %v956_v58, %v940_v57 }
 0xd27   :  { %3289 = vtanh.f32 %v960_v60 }
 0xd2f   :  { %v3288_v61 = vpop.eup %3287 }
 0xd30   :  { %965 = vrot.lane.b32.xlu1 %v3288_v61, %s3570_s3 }
 0xd31   :  { %v3290_v62 = vpop.eup %3289 }
 0xd32   :  { %967 = vrot.lane.b32.xlu0 %v3290_v62, %s3570_s3 }
 0xda2   :  { %v966_v2 = vpop.permute.xlu1 %965 }
 0xda3   :  { %v971_v4 = vmul.f32 %v3284_v48, %v966_v2 }
 0xda4   :  { %v968_v3 = vpop.permute.xlu0 %967 }
 0xda5   :  { %v972_v5 = vmul.f32 %v3286_v51, %v968_v3  ;;  %v981_v8 = vrot.slane %v971_v4, %v3701_v63 }
 0xda7   :  { %v988_v6 = vrot.slane %v972_v5, %v3701_v63  ;;  %v1002_v7 = vrot.slane %v972_v5, 7 }
 0xda9   :  { %v991_v10 = vrot.slane %v988_v6, 7  ;;  %v1003_v11 = vsel %vm350_vm4, %v1002_v7, %v971_v4  ;;  %v1159_v4 = vld [vmem:[#allocation4 + $0x6] sm:$0x1] }
 0xdaa   :  { %1004 = vrot.lane.b32.xlu0 %v1003_v11, %s3569_s2 }
 0xdab   :  { %v992_v12 = vsel %vm350_vm4, %v991_v10, %v981_v8 }
 0xdac   :  { %v993_v13 = vsel %vm352_vm5, %v991_v10, %v992_v12 }
 0xdad   :  { %v994_v14 = vsel %vm354_vm6, %v991_v10, %v993_v13 }
 0xdae   :  { %v3805_v17 = vsel %vm356_vm7, %v991_v10, %v994_v14  ;;  %v1160_v10 = vld [vmem:[#allocation4 + $0x16] sm:$0x1] }
 0xe1c   :  { %v1005_v18 = vpop.permute.xlu0 %1004 }
 0xe1d   :  { %2986 = vmatmul.mubr.msk.f32.vlgmr.msra.gmra.mrb[8].mxu0 %vm193_vm3, %v1005_v18 }
 0xe1e   :  { %3146 = vmatpush3.bf16.msra.mxu0 %v3659_v9  ;;  %3007 = vmatprep.mubr.msk.f32.mxu0 %vm3567_vm0, %v3568_v1 }
 0xe1f   :  { %3147 = vmatprep.subr.bf16.mxu0 %v3566_v0 }
 0xe22   :  { %3149 = vmatpush3.bf16.msra.mxu0 %v3662_v15 }
 0xe23   :  { %3156 = vmatprep.subr.bf16.mxu0 %v3566_v0 }
 0xef0   :  { %v1074_v20 = vpop.f32.mrb[8].mxu0 }
 0xef1   :  { %v1079_v21 = vrot.slane %v1074_v20, 1  ;;  %v1082_v22 = vadd.f32 %v1074_v20, %v1000_v19  ;;  %v2987_v23 = vpop.f32.mrb[9].mxu0 }
 0xef3   :  { %v1083_v25 = vadd.f32 %v1079_v21, %v1001_v24  ;;  %3291 = vtanh.f32 %v1082_v22  ;;  %v2794_v28 = vmul.f32 -1.442695, %v1082_v22 }
 0xef5   :  { %3293 = vtanh.f32 %v1083_v25  ;;  %v2795_v29 = vmul.f32 -1.442695, %v1083_v25 }
 0xef6   :  { %3295 = vpow2.f32 %v2794_v28 }
 0xef7   :  { %3297 = vpow2.f32 %v2795_v29 }
 0xefd   :  { %v3292_v26 = vpop.eup %3291 }
 0xefe   :  { %1102 = vrot.lane.b32.xlu0 %v3292_v26, %s3570_s3 }
 0xeff   :  { %v3294_v27 = vpop.eup %3293 }
 0xf00   :  { %1104 = vrot.lane.b32.xlu1 %v3294_v27, %s3570_s3  ;;  %v3296_v31 = vpop.eup %3295 }
 0xf01   :  { %v3298_v32 = vpop.eup %3297  ;;  %v1090_v33 = vadd.f32 1.0, %v3296_v31 }
 0xf02   :  { %v1091_v34 = vadd.f32 1.0, %v3298_v32 }
 0xf03   :  { %3299 = vrcp.f32 %v1090_v33 }
 0xf04   :  { %3301 = vrcp.f32 %v1091_v34 }
 0xf0d   :  { %v3300_v35 = vpop.eup %3299 }
 0xf0e   :  { %v3302_v38 = vpop.eup %3301  ;;  %v1098_v41 = vmul.f32 %v3300_v35, %v959_v56 }
 0xf0f   :  { %v1099_v45 = vmul.f32 %v3302_v38, %v960_v60 }
 0xf70   :  { %v1103_v36 = vpop.permute.xlu0 %1102 }
 0xf71   :  { %v1108_v37 = vmul.f32 %v3300_v35, %v1103_v36 }
 0xf72   :  { %v1105_v39 = vpop.permute.xlu1 %1104 }
 0xf73   :  { %1112 = vrot.lane.b32.xlu0 %v1108_v37, %s3569_s2  ;;  %v1109_v40 = vmul.f32 %v3302_v38, %v1105_v39 }
 0xf75   :  { %1114 = vrot.lane.b32.xlu1 %v1109_v40, %s3569_s2 }
 0xfe5   :  { %v1113_v42 = vpop.permute.xlu0 %1112 }
 0xfe6   :  { %v1118_v43 = vadd.f32 %v1113_v42, %v1098_v41 }
 0xfe7   :  { %v1115_v46 = vpop.permute.xlu1 %1114 }
 0xfe8   :  { %3303 = vtanh.f32 %v1118_v43  ;;  %v1119_v47 = vadd.f32 %v1115_v46, %v1099_v45 }
 0xfea   :  { %3305 = vtanh.f32 %v1119_v47 }
 0xff2   :  { %v3304_v48 = vpop.eup %3303 }
 0xff3   :  { %1124 = vrot.lane.b32.xlu0 %v3304_v48, %s3570_s3 }
 0xff4   :  { %v3306_v49 = vpop.eup %3305 }
 0xff5   :  { %1126 = vrot.lane.b32.xlu1 %v3306_v49, %s3570_s3 }
0x1065   :  { %v1125_v50 = vpop.permute.xlu0 %1124 }
0x1066   :  { %v1130_v53 = vmul.f32 %v3300_v35, %v1125_v50 }
0x1067   :  { %v1127_v51 = vpop.permute.xlu1 %1126 }
0x1068   :  { %v1131_v54 = vmul.f32 %v3302_v38, %v1127_v51  ;;  %v1140_v56 = vrot.slane %v1130_v53, %v3701_v63 }
0x106a   :  { %v1147_v52 = vrot.slane %v1131_v54, %v3701_v63  ;;  %v1161_v55 = vrot.slane %v1131_v54, 7  ;;  %v1318_v54 = vld [vmem:[#allocation4 + $0x7] sm:$0x1] }
0x106c   :  { %v1150_v57 = vrot.slane %v1147_v52, 7  ;;  %v1162_v58 = vsel %vm350_vm4, %v1161_v55, %v1130_v53 }
0x106d   :  { %1163 = vrot.lane.b32.xlu1 %v1162_v58, %s3569_s2  ;;  %v1319_v58 = vld [vmem:[#allocation4 + $0x17] sm:$0x1] }
0x106e   :  { %v1151_v60 = vsel %vm350_vm4, %v1150_v57, %v1140_v56 }
0x106f   :  { %v1152_v61 = vsel %vm352_vm5, %v1150_v57, %v1151_v60 }
0x1070   :  { %v1153_v62 = vsel %vm354_vm6, %v1150_v57, %v1152_v61 }
0x1071   :  { %v3828_v2 = vsel %vm356_vm7, %v1150_v57, %v1153_v62 }
0x10df   :  { %v1164_v3 = vpop.permute.xlu1 %1163 }
0x10e0   :  { %2997 = vmatmul.mubr.msk.f32.vlgmr.msra.gmra.mrb[6].mxu1 %vm193_vm3, %v1164_v3 }
0x10e1   :  { %3152 = vmatpush3.bf16.msra.mxu1 %v3659_v9  ;;  %3018 = vmatprep.mubr.msk.f32.mxu1 %vm3567_vm0, %v3568_v1 }
0x10e2   :  { %3153 = vmatprep.subr.bf16.mxu1 %v3566_v0 }
0x10e5   :  { %3155 = vmatpush3.bf16.msra.mxu1 %v3662_v15 }
0x10e6   :  { %3162 = vmatprep.subr.bf16.mxu1 %v3566_v0 }
0x11b3   :  { %v1233_v5 = vpop.f32.mrb[6].mxu1 }
0x11b4   :  { %v1238_v6 = vrot.slane %v1233_v5, 1  ;;  %v1241_v7 = vadd.f32 %v1233_v5, %v1159_v4  ;;  %v2998_v8 = vpop.f32.mrb[7].mxu1 }
0x11b6   :  { %v1242_v11 = vadd.f32 %v1238_v6, %v1160_v10  ;;  %3307 = vtanh.f32 %v1241_v7  ;;  %v2797_v14 = vmul.f32 -1.442695, %v1241_v7 }
0x11b8   :  { %3309 = vtanh.f32 %v1242_v11  ;;  %v2798_v18 = vmul.f32 -1.442695, %v1242_v11 }
0x11b9   :  { %3311 = vpow2.f32 %v2797_v14 }
0x11ba   :  { %3313 = vpow2.f32 %v2798_v18 }
0x11c0   :  { %v3308_v12 = vpop.eup %3307 }
0x11c1   :  { %1261 = vrot.lane.b32.xlu1 %v3308_v12, %s3570_s3 }
0x11c2   :  { %v3310_v13 = vpop.eup %3309 }
0x11c3   :  { %1263 = vrot.lane.b32.xlu0 %v3310_v13, %s3570_s3  ;;  %v3312_v19 = vpop.eup %3311 }
0x11c4   :  { %v3314_v20 = vpop.eup %3313  ;;  %v1249_v21 = vadd.f32 1.0, %v3312_v19 }
0x11c5   :  { %v1250_v22 = vadd.f32 1.0, %v3314_v20 }
0x11c6   :  { %3315 = vrcp.f32 %v1249_v21 }
0x11c7   :  { %3317 = vrcp.f32 %v1250_v22 }
0x11d0   :  { %v3316_v23 = vpop.eup %3315 }
0x11d1   :  { %v3318_v26 = vpop.eup %3317  ;;  %v1257_v29 = vmul.f32 %v3316_v23, %v1118_v43 }
0x11d2   :  { %v1258_v33 = vmul.f32 %v3318_v26, %v1119_v47 }
0x1233   :  { %v1262_v24 = vpop.permute.xlu1 %1261 }
0x1234   :  { %v1267_v25 = vmul.f32 %v3316_v23, %v1262_v24 }
0x1235   :  { %v1264_v27 = vpop.permute.xlu0 %1263 }
0x1236   :  { %1271 = vrot.lane.b32.xlu1 %v1267_v25, %s3569_s2  ;;  %v1268_v28 = vmul.f32 %v3318_v26, %v1264_v27 }
0x1238   :  { %1273 = vrot.lane.b32.xlu0 %v1268_v28, %s3569_s2 }
0x12a8   :  { %v1272_v31 = vpop.permute.xlu1 %1271 }
0x12a9   :  { %v1277_v32 = vadd.f32 %v1272_v31, %v1257_v29 }
0x12aa   :  { %v1274_v34 = vpop.permute.xlu0 %1273 }
0x12ab   :  { %3319 = vtanh.f32 %v1277_v32  ;;  %v1278_v35 = vadd.f32 %v1274_v34, %v1258_v33 }
0x12ad   :  { %3321 = vtanh.f32 %v1278_v35 }
0x12b5   :  { %v3320_v36 = vpop.eup %3319 }
0x12b6   :  { %1283 = vrot.lane.b32.xlu1 %v3320_v36, %s3570_s3 }
0x12b7   :  { %v3322_v37 = vpop.eup %3321 }
0x12b8   :  { %1285 = vrot.lane.b32.xlu0 %v3322_v37, %s3570_s3 }
0x1328   :  { %v1284_v38 = vpop.permute.xlu1 %1283 }
0x1329   :  { %v1289_v40 = vmul.f32 %v3316_v23, %v1284_v38 }
0x132a   :  { %v1286_v39 = vpop.permute.xlu0 %1285 }
0x132b   :  { %v1290_v41 = vmul.f32 %v3318_v26, %v1286_v39  ;;  %v1299_v45 = vrot.slane %v1289_v40, %v3701_v63 }
0x132d   :  { %v1306_v42 = vrot.slane %v1290_v41, %v3701_v63  ;;  %v1320_v43 = vrot.slane %v1290_v41, 7 }
0x132f   :  { %v1309_v46 = vrot.slane %v1306_v42, 7  ;;  %v1321_v47 = vsel %vm350_vm4, %v1320_v43, %v1289_v40  ;;  %v1475_v42 = vld [vmem:[#allocation4 + $0x8] sm:$0x1] }
0x1330   :  { %1322 = vrot.lane.b32.xlu0 %v1321_v47, %s3569_s2 }
0x1331   :  { %v1310_v48 = vsel %vm350_vm4, %v1309_v46, %v1299_v45 }
0x1332   :  { %v1311_v49 = vsel %vm352_vm5, %v1309_v46, %v1310_v48  ;;  %v1476_v48 = vld [vmem:[#allocation4 + $0x18] sm:$0x1] }
0x1333   :  { %v1312_v50 = vsel %vm354_vm6, %v1309_v46, %v1311_v49 }
0x1334   :  { %v3851_v51 = vsel %vm356_vm7, %v1309_v46, %v1312_v50 }
0x13a2   :  { %v1323_v53 = vpop.permute.xlu0 %1322 }
0x13a3   :  { %3008 = vmatmul.mubr.msk.f32.vlgmr.msra.gmra.mrb[10].mxu0 %vm193_vm3, %v1323_v53 }
0x13a4   :  { %3158 = vmatpush3.bf16.msra.mxu0 %v3659_v9  ;;  %3029 = vmatprep.mubr.msk.f32.mxu0 %vm3567_vm0, %v3568_v1 }
0x13a5   :  { %3159 = vmatprep.subr.bf16.mxu0 %v3566_v0 }
0x13a8   :  { %3161 = vmatpush3.bf16.msra.mxu0 %v3662_v15 }
0x13a9   :  { %3168 = vmatprep.subr.bf16.mxu0 %v3566_v0 }
0x1476   :  { %v1392_v52 = vpop.f32.mrb[10].mxu0 }
0x1477   :  { %v1397_v55 = vrot.slane %v1392_v52, 1  ;;  %v1400_v56 = vadd.f32 %v1392_v52, %v1318_v54  ;;  %v3009_v57 = vpop.f32.mrb[11].mxu0 }
0x1479   :  { %v1401_v60 = vadd.f32 %v1397_v55, %v1319_v58  ;;  %3323 = vtanh.f32 %v1400_v56  ;;  %v2800_v3 = vmul.f32 -1.442695, %v1400_v56 }
0x147b   :  { %3325 = vtanh.f32 %v1401_v60  ;;  %v2801_v4 = vmul.f32 -1.442695, %v1401_v60 }
0x147c   :  { %3327 = vpow2.f32 %v2800_v3 }
0x147d   :  { %3329 = vpow2.f32 %v2801_v4 }
0x1483   :  { %v3324_v61 = vpop.eup %3323 }
0x1484   :  { %1420 = vrot.lane.b32.xlu0 %v3324_v61, %s3570_s3 }
0x1485   :  { %v3326_v62 = vpop.eup %3325 }
0x1486   :  { %1422 = vrot.lane.b32.xlu1 %v3326_v62, %s3570_s3  ;;  %v3328_v5 = vpop.eup %3327 }
0x1487   :  { %v3330_v6 = vpop.eup %3329  ;;  %v1408_v7 = vadd.f32 1.0, %v3328_v5 }
0x1488   :  { %v1409_v8 = vadd.f32 1.0, %v3330_v6 }
0x1489   :  { %3331 = vrcp.f32 %v1408_v7 }
0x148a   :  { %3333 = vrcp.f32 %v1409_v8 }
0x1493   :  { %v3332_v10 = vpop.eup %3331 }
0x1494   :  { %v3334_v13 = vpop.eup %3333  ;;  %v1416_v19 = vmul.f32 %v3332_v10, %v1277_v32 }
0x1495   :  { %v1417_v22 = vmul.f32 %v3334_v13, %v1278_v35 }
0x14f6   :  { %v1421_v11 = vpop.permute.xlu0 %1420 }
0x14f7   :  { %v1426_v12 = vmul.f32 %v3332_v10, %v1421_v11 }
0x14f8   :  { %v1423_v14 = vpop.permute.xlu1 %1422 }
0x14f9   :  { %1430 = vrot.lane.b32.xlu0 %v1426_v12, %s3569_s2  ;;  %v1427_v18 = vmul.f32 %v3334_v13, %v1423_v14 }
0x14fb   :  { %1432 = vrot.lane.b32.xlu1 %v1427_v18, %s3569_s2 }
0x156b   :  { %v1431_v20 = vpop.permute.xlu0 %1430 }
0x156c   :  { %v1436_v21 = vadd.f32 %v1431_v20, %v1416_v19 }
0x156d   :  { %v1433_v23 = vpop.permute.xlu1 %1432 }
0x156e   :  { %3335 = vtanh.f32 %v1436_v21  ;;  %v1437_v24 = vadd.f32 %v1433_v23, %v1417_v22 }
0x1570   :  { %3337 = vtanh.f32 %v1437_v24 }
0x1578   :  { %v3336_v25 = vpop.eup %3335 }
0x1579   :  { %1442 = vrot.lane.b32.xlu0 %v3336_v25, %s3570_s3 }
0x157a   :  { %v3338_v26 = vpop.eup %3337 }
0x157b   :  { %1444 = vrot.lane.b32.xlu1 %v3338_v26, %s3570_s3 }
0x15eb   :  { %v1443_v27 = vpop.permute.xlu0 %1442 }
0x15ec   :  { %v1448_v29 = vmul.f32 %v3332_v10, %v1443_v27 }
0x15ed   :  { %v1445_v28 = vpop.permute.xlu1 %1444 }
0x15ee   :  { %v1449_v31 = vmul.f32 %v3334_v13, %v1445_v28  ;;  %v1458_v34 = vrot.slane %v1448_v29, %v3701_v63 }
0x15f0   :  { %v1465_v33 = vrot.slane %v1449_v31, %v3701_v63  ;;  %v1477_v32 = vrot.slane %v1449_v31, 7 }
0x15f2   :  { %v1468_v35 = vrot.slane %v1465_v33, 7  ;;  %v1478_v36 = vsel %vm350_vm4, %v1477_v32, %v1448_v29  ;;  %v1634_v32 = vld [vmem:[#allocation4 + $0x9] sm:$0x1] }
0x15f3   :  { %1479 = vrot.lane.b32.xlu1 %v1478_v36, %s3569_s2 }
0x15f4   :  { %v1469_v37 = vsel %vm350_vm4, %v1468_v35, %v1458_v34 }
0x15f5   :  { %v1470_v38 = vsel %vm352_vm5, %v1468_v35, %v1469_v37 }
0x15f6   :  { %v1471_v39 = vsel %vm354_vm6, %v1468_v35, %v1470_v38  ;;  %v1635_v38 = vld [vmem:[#allocation4 + $0x19] sm:$0x1] }
0x15f7   :  { %v3874_v40 = vsel %vm356_vm7, %v1468_v35, %v1471_v39 }
0x1665   :  { %v1480_v41 = vpop.permute.xlu1 %1479 }
0x1666   :  { %3019 = vmatmul.mubr.msk.f32.vlgmr.msra.gmra.mrb[8].mxu1 %vm193_vm3, %v1480_v41 }
0x1667   :  { %3164 = vmatpush3.bf16.msra.mxu1 %v3659_v9  ;;  %3040 = vmatprep.mubr.msk.f32.mxu1 %vm3567_vm0, %v3568_v1 }
0x1668   :  { %3165 = vmatprep.subr.bf16.mxu1 %v3566_v0 }
0x166b   :  { %3167 = vmatpush3.bf16.msra.mxu1 %v3662_v15 }
0x166c   :  { %3174 = vmatprep.subr.bf16.mxu1 %v3566_v0 }
0x1739   :  { %v1549_v43 = vpop.f32.mrb[8].mxu1 }
0x173a   :  { %v1554_v45 = vrot.slane %v1549_v43, 1  ;;  %v1557_v46 = vadd.f32 %v1549_v43, %v1475_v42  ;;  %v3020_v47 = vpop.f32.mrb[9].mxu1 }
0x173c   :  { %v1558_v49 = vadd.f32 %v1554_v45, %v1476_v48  ;;  %3339 = vtanh.f32 %v1557_v46  ;;  %v2803_v54 = vmul.f32 -1.442695, %v1557_v46 }
0x173e   :  { %3341 = vtanh.f32 %v1558_v49  ;;  %v2804_v52 = vmul.f32 -1.442695, %v1558_v49 }
0x173f   :  { %3343 = vpow2.f32 %v2803_v54 }
0x1740   :  { %3345 = vpow2.f32 %v2804_v52 }
0x1746   :  { %v3340_v50 = vpop.eup %3339 }
0x1747   :  { %1577 = vrot.lane.b32.xlu1 %v3340_v50, %s3570_s3 }
0x1748   :  { %v3342_v53 = vpop.eup %3341 }
0x1749   :  { %1579 = vrot.lane.b32.xlu0 %v3342_v53, %s3570_s3  ;;  %v3344_v55 = vpop.eup %3343 }
0x174a   :  { %v3346_v56 = vpop.eup %3345  ;;  %v1565_v57 = vadd.f32 1.0, %v3344_v55 }
0x174b   :  { %v1566_v58 = vadd.f32 1.0, %v3346_v56 }
0x174c   :  { %3347 = vrcp.f32 %v1565_v57 }
0x174d   :  { %3349 = vrcp.f32 %v1566_v58 }
0x1756   :  { %v3348_v60 = vpop.eup %3347 }
0x1757   :  { %v3350_v3 = vpop.eup %3349  ;;  %v1573_v6 = vmul.f32 %v3348_v60, %v1436_v21 }
0x1758   :  { %v1574_v10 = vmul.f32 %v3350_v3, %v1437_v24 }
0x17b9   :  { %v1578_v61 = vpop.permute.xlu1 %1577 }
0x17ba   :  { %v1583_v62 = vmul.f32 %v3348_v60, %v1578_v61 }
0x17bb   :  { %v1580_v4 = vpop.permute.xlu0 %1579 }
0x17bc   :  { %1587 = vrot.lane.b32.xlu1 %v1583_v62, %s3569_s2  ;;  %v1584_v5 = vmul.f32 %v3350_v3, %v1580_v4 }
0x17be   :  { %1589 = vrot.lane.b32.xlu0 %v1584_v5, %s3569_s2 }
0x182e   :  { %v1588_v7 = vpop.permute.xlu1 %1587 }
0x182f   :  { %v1593_v8 = vadd.f32 %v1588_v7, %v1573_v6 }
0x1830   :  { %v1590_v11 = vpop.permute.xlu0 %1589 }
0x1831   :  { %3351 = vtanh.f32 %v1593_v8  ;;  %v1594_v12 = vadd.f32 %v1590_v11, %v1574_v10 }
0x1833   :  { %3353 = vtanh.f32 %v1594_v12 }
0x183b   :  { %v3352_v13 = vpop.eup %3351 }
0x183c   :  { %1599 = vrot.lane.b32.xlu1 %v3352_v13, %s3570_s3 }
0x183d   :  { %v3354_v14 = vpop.eup %3353 }
0x183e   :  { %1601 = vrot.lane.b32.xlu0 %v3354_v14, %s3570_s3 }
0x18ae   :  { %v1600_v18 = vpop.permute.xlu1 %1599 }
0x18af   :  { %v1605_v20 = vmul.f32 %v3348_v60, %v1600_v18 }
0x18b0   :  { %v1602_v19 = vpop.permute.xlu0 %1601 }
0x18b1   :  { %v1606_v22 = vmul.f32 %v3350_v3, %v1602_v19  ;;  %v1615_v25 = vrot.slane %v1605_v20, %v3701_v63 }
0x18b3   :  { %v1622_v23 = vrot.slane %v1606_v22, %v3701_v63  ;;  %v1636_v21 = vrot.slane %v1606_v22, 7 }
0x18b5   :  { %v1625_v24 = vrot.slane %v1622_v23, 7  ;;  %v1637_v26 = vsel %vm350_vm4, %v1636_v21, %v1605_v20 }
0x18b6   :  { %1638 = vrot.lane.b32.xlu0 %v1637_v26, %s3569_s2 }
0x18b7   :  { %v1626_v27 = vsel %vm350_vm4, %v1625_v24, %v1615_v25  ;;  %v1793_v25 = vld [vmem:[#allocation4 + $0xa] sm:$0x1] }
0x18b8   :  { %v1627_v28 = vsel %vm352_vm5, %v1625_v24, %v1626_v27 }
0x18b9   :  { %v1628_v29 = vsel %vm354_vm6, %v1625_v24, %v1627_v28 }
0x18ba   :  { %v3897_v31 = vsel %vm356_vm7, %v1625_v24, %v1628_v29  ;;  %v1794_v29 = vld [vmem:[#allocation4 + $0x1a] sm:$0x1] }
0x1928   :  { %v1639_v33 = vpop.permute.xlu0 %1638 }
0x1929   :  { %3030 = vmatmul.mubr.msk.f32.vlgmr.msra.gmra.mrb[12].mxu0 %vm193_vm3, %v1639_v33 }
0x192a   :  { %3170 = vmatpush3.bf16.msra.mxu0 %v3659_v9  ;;  %3051 = vmatprep.mubr.msk.f32.mxu0 %vm3567_vm0, %v3568_v1 }
0x192b   :  { %3171 = vmatprep.subr.bf16.mxu0 %v3566_v0 }
0x192e   :  { %3173 = vmatpush3.bf16.msra.mxu0 %v3662_v15 }
0x192f   :  { %3180 = vmatprep.subr.bf16.mxu0 %v3566_v0 }
0x19fc   :  { %v1708_v34 = vpop.f32.mrb[12].mxu0 }
0x19fd   :  { %v1713_v35 = vrot.slane %v1708_v34, 1  ;;  %v1716_v36 = vadd.f32 %v1708_v34, %v1634_v32  ;;  %v3031_v37 = vpop.f32.mrb[13].mxu0 }
0x19ff   :  { %v1717_v39 = vadd.f32 %v1713_v35, %v1635_v38  ;;  %3355 = vtanh.f32 %v1716_v36  ;;  %v2806_v43 = vmul.f32 -1.442695, %v1716_v36 }
0x1a01   :  { %3357 = vtanh.f32 %v1717_v39  ;;  %v2807_v45 = vmul.f32 -1.442695, %v1717_v39 }
0x1a02   :  { %3359 = vpow2.f32 %v2806_v43 }
0x1a03   :  { %3361 = vpow2.f32 %v2807_v45 }
0x1a09   :  { %v3356_v41 = vpop.eup %3355 }
0x1a0a   :  { %1736 = vrot.lane.b32.xlu0 %v3356_v41, %s3570_s3 }
0x1a0b   :  { %v3358_v42 = vpop.eup %3357 }
0x1a0c   :  { %1738 = vrot.lane.b32.xlu1 %v3358_v42, %s3570_s3  ;;  %v3360_v46 = vpop.eup %3359 }
0x1a0d   :  { %v3362_v47 = vpop.eup %3361  ;;  %v1724_v48 = vadd.f32 1.0, %v3360_v46 }
0x1a0e   :  { %v1725_v49 = vadd.f32 1.0, %v3362_v47 }
0x1a0f   :  { %3363 = vrcp.f32 %v1724_v48 }
0x1a10   :  { %3365 = vrcp.f32 %v1725_v49 }
0x1a19   :  { %v3364_v50 = vpop.eup %3363 }
0x1a1a   :  { %v3366_v52 = vpop.eup %3365  ;;  %v1732_v57 = vmul.f32 %v3364_v50, %v1593_v8 }
0x1a1b   :  { %v1733_v61 = vmul.f32 %v3366_v52, %v1594_v12 }
0x1a7c   :  { %v1737_v53 = vpop.permute.xlu0 %1736 }
0x1a7d   :  { %v1742_v54 = vmul.f32 %v3364_v50, %v1737_v53 }
0x1a7e   :  { %v1739_v55 = vpop.permute.xlu1 %1738 }
0x1a7f   :  { %1746 = vrot.lane.b32.xlu0 %v1742_v54, %s3569_s2  ;;  %v1743_v56 = vmul.f32 %v3366_v52, %v1739_v55 }
0x1a81   :  { %1748 = vrot.lane.b32.xlu1 %v1743_v56, %s3569_s2 }
0x1af1   :  { %v1747_v58 = vpop.permute.xlu0 %1746 }
0x1af2   :  { %v1752_v60 = vadd.f32 %v1747_v58, %v1732_v57 }
0x1af3   :  { %v1749_v62 = vpop.permute.xlu1 %1748 }
0x1af4   :  { %3367 = vtanh.f32 %v1752_v60  ;;  %v1753_v3 = vadd.f32 %v1749_v62, %v1733_v61 }
0x1af6   :  { %3369 = vtanh.f32 %v1753_v3 }
0x1afe   :  { %v3368_v4 = vpop.eup %3367 }
0x1aff   :  { %1758 = vrot.lane.b32.xlu0 %v3368_v4, %s3570_s3 }
0x1b00   :  { %v3370_v5 = vpop.eup %3369 }
0x1b01   :  { %1760 = vrot.lane.b32.xlu1 %v3370_v5, %s3570_s3 }
0x1b71   :  { %v1759_v6 = vpop.permute.xlu0 %1758 }
0x1b72   :  { %v1764_v10 = vmul.f32 %v3364_v50, %v1759_v6 }
0x1b73   :  { %v1761_v7 = vpop.permute.xlu1 %1760 }
0x1b74   :  { %v1765_v11 = vmul.f32 %v3366_v52, %v1761_v7  ;;  %v1774_v14 = vrot.slane %v1764_v10, %v3701_v63 }
0x1b76   :  { %v1781_v13 = vrot.slane %v1765_v11, %v3701_v63  ;;  %v1795_v8 = vrot.slane %v1765_v11, 7 }
0x1b78   :  { %v1784_v12 = vrot.slane %v1781_v13, 7  ;;  %v1796_v18 = vsel %vm350_vm4, %v1795_v8, %v1764_v10 }
0x1b79   :  { %1797 = vrot.lane.b32.xlu1 %v1796_v18, %s3569_s2 }
0x1b7a   :  { %v1785_v19 = vsel %vm350_vm4, %v1784_v12, %v1774_v14 }
0x1b7b   :  { %v1786_v20 = vsel %vm352_vm5, %v1784_v12, %v1785_v19 }
0x1b7c   :  { %v1787_v22 = vsel %vm354_vm6, %v1784_v12, %v1786_v20 }
0x1b7d   :  { %v3920_v23 = vsel %vm356_vm7, %v1784_v12, %v1787_v22  ;;  %v1952_v12 = vld [vmem:[#allocation4 + $0xb] sm:$0x1] }
0x1beb   :  { %v1798_v21 = vpop.permute.xlu1 %1797 }
0x1bec   :  { %3041 = vmatmul.mubr.msk.f32.vlgmr.msra.gmra.mrb[10].mxu1 %vm193_vm3, %v1798_v21  ;;  %v1953_v21 = vld [vmem:[#allocation4 + $0x1b] sm:$0x1] }
0x1bed   :  { %3176 = vmatpush3.bf16.msra.mxu1 %v3659_v9  ;;  %3062 = vmatprep.mubr.msk.f32.mxu1 %vm3567_vm0, %v3568_v1 }
0x1bee   :  { %3177 = vmatprep.subr.bf16.mxu1 %v3566_v0 }
0x1bf1   :  { %3179 = vmatpush3.bf16.msra.mxu1 %v3662_v15 }
0x1bf2   :  { %3186 = vmatprep.subr.bf16.mxu1 %v3566_v0 }
0x1cbf   :  { %v1867_v24 = vpop.f32.mrb[10].mxu1 }
0x1cc0   :  { %v1872_v26 = vrot.slane %v1867_v24, 1  ;;  %v1875_v27 = vadd.f32 %v1867_v24, %v1793_v25  ;;  %v3042_v28 = vpop.f32.mrb[11].mxu1 }
0x1cc2   :  { %v1876_v33 = vadd.f32 %v1872_v26, %v1794_v29  ;;  %3371 = vtanh.f32 %v1875_v27  ;;  %v2809_v35 = vmul.f32 -1.442695, %v1875_v27 }
0x1cc4   :  { %3373 = vtanh.f32 %v1876_v33  ;;  %v2810_v36 = vmul.f32 -1.442695, %v1876_v33 }
0x1cc5   :  { %3375 = vpow2.f32 %v2809_v35 }
0x1cc6   :  { %3377 = vpow2.f32 %v2810_v36 }
0x1ccc   :  { %v3372_v32 = vpop.eup %3371 }
0x1ccd   :  { %1895 = vrot.lane.b32.xlu1 %v3372_v32, %s3570_s3 }
0x1cce   :  { %v3374_v34 = vpop.eup %3373 }
0x1ccf   :  { %1897 = vrot.lane.b32.xlu0 %v3374_v34, %s3570_s3  ;;  %v3376_v37 = vpop.eup %3375 }
0x1cd0   :  { %v3378_v38 = vpop.eup %3377  ;;  %v1883_v39 = vadd.f32 1.0, %v3376_v37 }
0x1cd1   :  { %v1884_v41 = vadd.f32 1.0, %v3378_v38 }
0x1cd2   :  { %3379 = vrcp.f32 %v1883_v39 }
0x1cd3   :  { %3381 = vrcp.f32 %v1884_v41 }
0x1cdc   :  { %v3380_v42 = vpop.eup %3379 }
0x1cdd   :  { %v3382_v46 = vpop.eup %3381  ;;  %v1891_v49 = vmul.f32 %v3380_v42, %v1752_v60 }
0x1cde   :  { %v1892_v54 = vmul.f32 %v3382_v46, %v1753_v3 }
0x1d3f   :  { %v1896_v43 = vpop.permute.xlu1 %1895 }
0x1d40   :  { %v1901_v45 = vmul.f32 %v3380_v42, %v1896_v43 }
0x1d41   :  { %v1898_v47 = vpop.permute.xlu0 %1897 }
0x1d42   :  { %1905 = vrot.lane.b32.xlu1 %v1901_v45, %s3569_s2  ;;  %v1902_v48 = vmul.f32 %v3382_v46, %v1898_v47 }
0x1d44   :  { %1907 = vrot.lane.b32.xlu0 %v1902_v48, %s3569_s2 }
0x1db4   :  { %v1906_v50 = vpop.permute.xlu1 %1905 }
0x1db5   :  { %v1911_v53 = vadd.f32 %v1906_v50, %v1891_v49 }
0x1db6   :  { %v1908_v52 = vpop.permute.xlu0 %1907 }
0x1db7   :  { %3383 = vtanh.f32 %v1911_v53  ;;  %v1912_v55 = vadd.f32 %v1908_v52, %v1892_v54 }
0x1db9   :  { %3385 = vtanh.f32 %v1912_v55 }
0x1dc1   :  { %v3384_v56 = vpop.eup %3383 }
0x1dc2   :  { %1917 = vrot.lane.b32.xlu1 %v3384_v56, %s3570_s3 }
0x1dc3   :  { %v3386_v57 = vpop.eup %3385 }
0x1dc4   :  { %1919 = vrot.lane.b32.xlu0 %v3386_v57, %s3570_s3 }
0x1e34   :  { %v1918_v58 = vpop.permute.xlu1 %1917 }
0x1e35   :  { %v1923_v62 = vmul.f32 %v3380_v42, %v1918_v58 }
0x1e36   :  { %v1920_v61 = vpop.permute.xlu0 %1919 }
0x1e37   :  { %v1924_v4 = vmul.f32 %v3382_v46, %v1920_v61  ;;  %v1933_v6 = vrot.slane %v1923_v62, %v3701_v63 }
0x1e39   :  { %v1940_v5 = vrot.slane %v1924_v4, %v3701_v63  ;;  %v1954_v60 = vrot.slane %v1924_v4, 7 }
0x1e3b   :  { %v1943_v3 = vrot.slane %v1940_v5, 7  ;;  %v1955_v7 = vsel %vm350_vm4, %v1954_v60, %v1923_v62 }
0x1e3c   :  { %1956 = vrot.lane.b32.xlu0 %v1955_v7, %s3569_s2  ;;  %v2109_v7 = vld [vmem:[#allocation4 + $0xc] sm:$0x1] }
0x1e3d   :  { %v1944_v10 = vsel %vm350_vm4, %v1943_v3, %v1933_v6 }
0x1e3e   :  { %v1945_v11 = vsel %vm352_vm5, %v1943_v3, %v1944_v10 }
0x1e3f   :  { %v1946_v13 = vsel %vm354_vm6, %v1943_v3, %v1945_v11 }
0x1e40   :  { %v3943_v8 = vsel %vm356_vm7, %v1943_v3, %v1946_v13 }
0x1eae   :  { %v1957_v14 = vpop.permute.xlu0 %1956 }
0x1eaf   :  { %3052 = vmatmul.mubr.msk.f32.vlgmr.msra.gmra.mrb[14].mxu0 %vm193_vm3, %v1957_v14 }
0x1eb0   :  { %3182 = vmatpush3.bf16.msra.mxu0 %v3659_v9  ;;  %3073 = vmatprep.mubr.msk.f32.mxu0 %vm3567_vm0, %v3568_v1 }
0x1eb1   :  { %3183 = vmatprep.subr.bf16.mxu0 %v3566_v0 }
0x1eb4   :  { %3185 = vmatpush3.bf16.msra.mxu0 %v3662_v15 }
0x1eb5   :  { %3192 = vmatprep.subr.bf16.mxu0 %v3566_v0 }
0x1f82   :  { %v2026_v18 = vpop.f32.mrb[14].mxu0 }
0x1f83   :  { %v2031_v19 = vrot.slane %v2026_v18, 1  ;;  %v2034_v20 = vadd.f32 %v2026_v18, %v1952_v12  ;;  %v3053_v22 = vpop.f32.mrb[15].mxu0  ;;  %v2110_v12 = vld [vmem:[#allocation4 + $0x1c] sm:$0x1] }
0x1f85   :  { %v2035_v25 = vadd.f32 %v2031_v19, %v1953_v21  ;;  %3387 = vtanh.f32 %v2034_v20  ;;  %v2812_v27 = vmul.f32 -1.442695, %v2034_v20 }
0x1f87   :  { %3389 = vtanh.f32 %v2035_v25  ;;  %v2813_v28 = vmul.f32 -1.442695, %v2035_v25 }
0x1f88   :  { %3391 = vpow2.f32 %v2812_v27 }
0x1f89   :  { %3393 = vpow2.f32 %v2813_v28 }
0x1f8f   :  { %v3388_v24 = vpop.eup %3387 }
0x1f90   :  { %2054 = vrot.lane.b32.xlu0 %v3388_v24, %s3570_s3 }
0x1f91   :  { %v3390_v26 = vpop.eup %3389 }
0x1f92   :  { %2056 = vrot.lane.b32.xlu1 %v3390_v26, %s3570_s3  ;;  %v3392_v29 = vpop.eup %3391 }
0x1f93   :  { %v3394_v33 = vpop.eup %3393  ;;  %v2042_v32 = vadd.f32 1.0, %v3392_v29 }
0x1f94   :  { %v2043_v34 = vadd.f32 1.0, %v3394_v33 }
0x1f95   :  { %3395 = vrcp.f32 %v2042_v32 }
0x1f96   :  { %3397 = vrcp.f32 %v2043_v34 }
0x1f9f   :  { %v3396_v35 = vpop.eup %3395 }
0x1fa0   :  { %v3398_v38 = vpop.eup %3397  ;;  %v2050_v42 = vmul.f32 %v3396_v35, %v1911_v53 }
0x1fa1   :  { %v2051_v46 = vmul.f32 %v3398_v38, %v1912_v55 }
0x2002   :  { %v2055_v36 = vpop.permute.xlu0 %2054 }
0x2003   :  { %v2060_v37 = vmul.f32 %v3396_v35, %v2055_v36 }
0x2004   :  { %v2057_v39 = vpop.permute.xlu1 %2056 }
0x2005   :  { %2064 = vrot.lane.b32.xlu0 %v2060_v37, %s3569_s2  ;;  %v2061_v41 = vmul.f32 %v3398_v38, %v2057_v39 }
0x2007   :  { %2066 = vrot.lane.b32.xlu1 %v2061_v41, %s3569_s2 }
0x2077   :  { %v2065_v43 = vpop.permute.xlu0 %2064 }
0x2078   :  { %v2070_v45 = vadd.f32 %v2065_v43, %v2050_v42 }
0x2079   :  { %v2067_v47 = vpop.permute.xlu1 %2066 }
0x207a   :  { %3399 = vtanh.f32 %v2070_v45  ;;  %v2071_v48 = vadd.f32 %v2067_v47, %v2051_v46 }
0x207c   :  { %3401 = vtanh.f32 %v2071_v48 }
0x2084   :  { %v3400_v49 = vpop.eup %3399 }
0x2085   :  { %2076 = vrot.lane.b32.xlu0 %v3400_v49, %s3570_s3 }
0x2086   :  { %v3402_v50 = vpop.eup %3401 }
0x2087   :  { %2078 = vrot.lane.b32.xlu1 %v3402_v50, %s3570_s3 }
0x20f7   :  { %v2077_v54 = vpop.permute.xlu0 %2076 }
0x20f8   :  { %v2082_v56 = vmul.f32 %v3396_v35, %v2077_v54 }
0x20f9   :  { %v2079_v52 = vpop.permute.xlu1 %2078 }
0x20fa   :  { %v2083_v57 = vmul.f32 %v3398_v38, %v2079_v52  ;;  %v2092_v61 = vrot.slane %v2082_v56, %v3701_v63 }
0x20fc   :  { %v2099_v58 = vrot.slane %v2083_v57, %v3701_v63  ;;  %v2111_v53 = vrot.slane %v2083_v57, 7 }
0x20fe   :  { %v2102_v55 = vrot.slane %v2099_v58, 7  ;;  %v2112_v62 = vsel %vm350_vm4, %v2111_v53, %v2082_v56 }
0x20ff   :  { %2113 = vrot.lane.b32.xlu1 %v2112_v62, %s3569_s2 }
0x2100   :  { %v2103_v4 = vsel %vm350_vm4, %v2102_v55, %v2092_v61 }
0x2101   :  { %v2104_v5 = vsel %vm352_vm5, %v2102_v55, %v2103_v4  ;;  %v2268_v4 = vld [vmem:[#allocation4 + $0xd] sm:$0x1] }
0x2102   :  { %v2105_v60 = vsel %vm354_vm6, %v2102_v55, %v2104_v5 }
0x2103   :  { %v3966_v6 = vsel %vm356_vm7, %v2102_v55, %v2105_v60 }
0x2171   :  { %v2114_v3 = vpop.permute.xlu1 %2113 }
0x2172   :  { %3063 = vmatmul.mubr.msk.f32.vlgmr.msra.gmra.mrb[12].mxu1 %vm193_vm3, %v2114_v3 }
0x2173   :  { %3188 = vmatpush3.bf16.msra.mxu1 %v3659_v9  ;;  %3084 = vmatprep.mubr.msk.f32.mxu1 %vm3567_vm0, %v3568_v1 }
0x2174   :  { %3189 = vmatprep.subr.bf16.mxu1 %v3566_v0 }
0x2177   :  { %3191 = vmatpush3.bf16.msra.mxu1 %v3662_v15 }
0x2245   :  { %v2183_v10 = vpop.f32.mrb[12].mxu1 }
0x2246   :  { %v2188_v11 = vrot.slane %v2183_v10, 1  ;;  %v2191_v13 = vadd.f32 %v2183_v10, %v2109_v7  ;;  %v3064_v14 = vpop.f32.mrb[13].mxu1  ;;  %v2269_v10 = vld [vmem:[#allocation4 + $0x1d] sm:$0x1] }
0x2248   :  { %v2192_v18 = vadd.f32 %v2188_v11, %v2110_v12  ;;  %3403 = vtanh.f32 %v2191_v13  ;;  %v2815_v22 = vmul.f32 -1.442695, %v2191_v13 }
0x224a   :  { %3405 = vtanh.f32 %v2192_v18  ;;  %v2816_v21 = vmul.f32 -1.442695, %v2192_v18 }
0x224b   :  { %3407 = vpow2.f32 %v2815_v22 }
0x224c   :  { %3409 = vpow2.f32 %v2816_v21 }
0x2252   :  { %v3404_v19 = vpop.eup %3403 }
0x2253   :  { %2211 = vrot.lane.b32.xlu1 %v3404_v19, %s3570_s3 }
0x2254   :  { %v3406_v20 = vpop.eup %3405 }
0x2255   :  { %2213 = vrot.lane.b32.xlu0 %v3406_v20, %s3570_s3  ;;  %v3408_v25 = vpop.eup %3407 }
0x2256   :  { %v3410_v24 = vpop.eup %3409  ;;  %v2199_v26 = vadd.f32 1.0, %v3408_v25 }
0x2257   :  { %v2200_v27 = vadd.f32 1.0, %v3410_v24 }
0x2258   :  { %3411 = vrcp.f32 %v2199_v26 }
0x2259   :  { %3413 = vrcp.f32 %v2200_v27 }
0x2262   :  { %v3412_v28 = vpop.eup %3411 }
0x2263   :  { %v3414_v32 = vpop.eup %3413  ;;  %v2207_v36 = vmul.f32 %v3412_v28, %v2070_v45 }
0x2264   :  { %v2208_v39 = vmul.f32 %v3414_v32, %v2071_v48 }
0x22c5   :  { %v2212_v29 = vpop.permute.xlu1 %2211 }
0x22c6   :  { %v2217_v33 = vmul.f32 %v3412_v28, %v2212_v29 }
0x22c7   :  { %v2214_v34 = vpop.permute.xlu0 %2213 }
0x22c8   :  { %2221 = vrot.lane.b32.xlu1 %v2217_v33, %s3569_s2  ;;  %v2218_v35 = vmul.f32 %v3414_v32, %v2214_v34 }
0x22ca   :  { %2223 = vrot.lane.b32.xlu0 %v2218_v35, %s3569_s2 }
0x233a   :  { %v2222_v37 = vpop.permute.xlu1 %2221 }
0x233b   :  { %v2227_v38 = vadd.f32 %v2222_v37, %v2207_v36 }
0x233c   :  { %v2224_v41 = vpop.permute.xlu0 %2223 }
0x233d   :  { %3415 = vtanh.f32 %v2227_v38  ;;  %v2228_v42 = vadd.f32 %v2224_v41, %v2208_v39 }
0x233f   :  { %3417 = vtanh.f32 %v2228_v42 }
0x2347   :  { %v3416_v43 = vpop.eup %3415 }
0x2348   :  { %2233 = vrot.lane.b32.xlu1 %v3416_v43, %s3570_s3 }
0x2349   :  { %v3418_v46 = vpop.eup %3417 }
0x234a   :  { %2235 = vrot.lane.b32.xlu0 %v3418_v46, %s3570_s3 }
0x23ba   :  { %v2234_v47 = vpop.permute.xlu1 %2233 }
0x23bb   :  { %v2239_v50 = vmul.f32 %v3412_v28, %v2234_v47 }
0x23bc   :  { %v2236_v49 = vpop.permute.xlu0 %2235 }
0x23bd   :  { %v2240_v54 = vmul.f32 %v3414_v32, %v2236_v49  ;;  %v2249_v56 = vrot.slane %v2239_v50, %v3701_v63 }
0x23bf   :  { %v2256_v52 = vrot.slane %v2240_v54, %v3701_v63  ;;  %v2270_v45 = vrot.slane %v2240_v54, 7 }
0x23c1   :  { %v2259_v48 = vrot.slane %v2256_v52, 7  ;;  %v2271_v57 = vsel %vm350_vm4, %v2270_v45, %v2239_v50 }
0x23c2   :  { %2272 = vrot.lane.b32.xlu0 %v2271_v57, %s3569_s2 }
0x23c3   :  { %v2260_v58 = vsel %vm350_vm4, %v2259_v48, %v2249_v56  ;;  %v2427_v56 = vld [vmem:[#allocation4 + $0xe] sm:$0x1] }
0x23c4   :  { %v2261_v53 = vsel %vm352_vm5, %v2259_v48, %v2260_v58 }
0x23c5   :  { %v2262_v61 = vsel %vm354_vm6, %v2259_v48, %v2261_v53 }
0x23c6   :  { %v3988_v55 = vsel %vm356_vm7, %v2259_v48, %v2262_v61  ;;  %v2428_v61 = vld [vmem:[#allocation4 + $0x1e] sm:$0x1] }
0x2434   :  { %v2273_v62 = vpop.permute.xlu0 %2272 }
0x2435   :  { %3074 = vmatmul.mubr.msk.f32.vlgmr.msra.gmra.mrb[16].mxu0 %vm193_vm3, %v2273_v62 }
0x2436   :  { %3194 = vmatpush3.bf16.msra.mxu0 %v3659_v9  ;;  %3095 = vmatprep.mubr.msk.f32.mxu0 %vm3567_vm0, %v3568_v1 }
0x2437   :  { %3195 = vmatprep.subr.bf16.mxu0 %v3566_v0 }
0x243a   :  { %3197 = vmatpush3.bf16.msra.mxu0 %v3662_v15 }
0x2508   :  { %v2342_v5 = vpop.f32.mrb[16].mxu0 }
0x2509   :  { %v2347_v60 = vrot.slane %v2342_v5, 1  ;;  %v2350_v3 = vadd.f32 %v2342_v5, %v2268_v4  ;;  %v3075_v7 = vpop.f32.mrb[17].mxu0 }
0x250b   :  { %v2351_v11 = vadd.f32 %v2347_v60, %v2269_v10  ;;  %3419 = vtanh.f32 %v2350_v3  ;;  %v2818_v1 = vmul.f32 -1.442695, %v2350_v3 }
0x250d   :  { %3421 = vtanh.f32 %v2351_v11  ;;  %v2819_v14 = vmul.f32 -1.442695, %v2351_v11 }
0x250e   :  { %3423 = vpow2.f32 %v2818_v1 }
0x250f   :  { %3425 = vpow2.f32 %v2819_v14 }
0x2515   :  { %v3420_v13 = vpop.eup %3419 }
0x2516   :  { %2370 = vrot.lane.b32.xlu0 %v3420_v13, %s3570_s3 }
0x2517   :  { %v3422_v9 = vpop.eup %3421 }
0x2518   :  { %2372 = vrot.lane.b32.xlu1 %v3422_v9, %s3570_s3  ;;  %v3424_v0 = vpop.eup %3423 }
0x2519   :  { %v3426_v15 = vpop.eup %3425  ;;  %v2358_v12 = vadd.f32 1.0, %v3424_v0 }
0x251a   :  { %v2359_v18 = vadd.f32 1.0, %v3426_v15 }
0x251b   :  { %3427 = vrcp.f32 %v2358_v12 }
0x251c   :  { %3429 = vrcp.f32 %v2359_v18 }
0x2525   :  { %v3428_v19 = vpop.eup %3427 }
0x2526   :  { %v3430_v21 = vpop.eup %3429  ;;  %v2366_v26 = vmul.f32 %v3428_v19, %v2227_v38 }
0x2527   :  { %v2367_v29 = vmul.f32 %v3430_v21, %v2228_v42 }
0x2588   :  { %v2371_v20 = vpop.permute.xlu0 %2370 }
0x2589   :  { %v2376_v22 = vmul.f32 %v3428_v19, %v2371_v20 }
0x258a   :  { %v2373_v25 = vpop.permute.xlu1 %2372 }
0x258b   :  { %2380 = vrot.lane.b32.xlu0 %v2376_v22, %s3569_s2  ;;  %v2377_v24 = vmul.f32 %v3430_v21, %v2373_v25 }
0x258d   :  { %2382 = vrot.lane.b32.xlu1 %v2377_v24, %s3569_s2 }
0x25fd   :  { %v2381_v27 = vpop.permute.xlu0 %2380 }
0x25fe   :  { %v2386_v28 = vadd.f32 %v2381_v27, %v2366_v26 }
0x25ff   :  { %v2383_v33 = vpop.permute.xlu1 %2382 }
0x2600   :  { %3431 = vtanh.f32 %v2386_v28  ;;  %v2387_v32 = vadd.f32 %v2383_v33, %v2367_v29 }
0x2602   :  { %3433 = vtanh.f32 %v2387_v32 }
0x260a   :  { %v3432_v34 = vpop.eup %3431 }
0x260b   :  { %2392 = vrot.lane.b32.xlu0 %v3432_v34, %s3570_s3 }
0x260c   :  { %v3434_v35 = vpop.eup %3433 }
0x260d   :  { %2394 = vrot.lane.b32.xlu1 %v3434_v35, %s3570_s3 }
0x267d   :  { %v2393_v36 = vpop.permute.xlu0 %2392 }
0x267e   :  { %v2398_v39 = vmul.f32 %v3428_v19, %v2393_v36 }
0x267f   :  { %v2395_v37 = vpop.permute.xlu1 %2394 }
0x2680   :  { %v2399_v41 = vmul.f32 %v3430_v21, %v2395_v37  ;;  %v2408_v46 = vrot.slane %v2398_v39, %v3701_v63 }
0x2682   :  { %v2415_v43 = vrot.slane %v2399_v41, %v3701_v63  ;;  %v2429_v38 = vrot.slane %v2399_v41, 7 }
0x2684   :  { %v2418_v42 = vrot.slane %v2415_v43, 7  ;;  %v2430_v47 = vsel %vm350_vm4, %v2429_v38, %v2398_v39 }
0x2685   :  { %2431 = vrot.lane.b32.xlu1 %v2430_v47, %s3569_s2 }
0x2686   :  { %v2419_v49 = vsel %vm350_vm4, %v2418_v42, %v2408_v46 }
0x2687   :  { %v2420_v50 = vsel %vm352_vm5, %v2418_v42, %v2419_v49 }
0x2688   :  { %v2421_v54 = vsel %vm354_vm6, %v2418_v42, %v2420_v50 }
0x2689   :  { %v4010_v52 = vsel %vm356_vm7, %v2418_v42, %v2421_v54  ;;  %v2586_v42 = vld [vmem:[#allocation4 + $0xf] sm:$0x1] }
0x26f7   :  { %v2432_v45 = vpop.permute.xlu1 %2431 }
0x26f8   :  { %3085 = vmatmul.mubr.msk.f32.vlgmr.msra.gmra.mrb[14].mxu1 %vm193_vm3, %v2432_v45  ;;  %v2587_v45 = vld [vmem:[#allocation4 + $0x1f] sm:$0x1] }
0x27cb   :  { %v2501_v48 = vpop.f32.mrb[14].mxu1 }
0x27cc   :  { %v2506_v57 = vrot.slane %v2501_v48, 1  ;;  %v2509_v58 = vadd.f32 %v2501_v48, %v2427_v56  ;;  %v3086_v53 = vpop.f32.mrb[15].mxu1 }
0x27ce   :  { %v2510_v62 = vadd.f32 %v2506_v57, %v2428_v61  ;;  %3435 = vtanh.f32 %v2509_v58  ;;  %v2821_v60 = vmul.f32 -1.442695, %v2509_v58 }
0x27d0   :  { %3437 = vtanh.f32 %v2510_v62  ;;  %v2822_v3 = vmul.f32 -1.442695, %v2510_v62 }
0x27d1   :  { %3439 = vpow2.f32 %v2821_v60 }
0x27d2   :  { %3441 = vpow2.f32 %v2822_v3 }
0x27d8   :  { %v3436_v4 = vpop.eup %3435 }
0x27d9   :  { %2529 = vrot.lane.b32.xlu1 %v3436_v4, %s3570_s3 }
0x27da   :  { %v3438_v5 = vpop.eup %3437 }
0x27db   :  { %2531 = vrot.lane.b32.xlu0 %v3438_v5, %s3570_s3  ;;  %v3440_v7 = vpop.eup %3439 }
0x27dc   :  { %v3442_v10 = vpop.eup %3441  ;;  %v2517_v11 = vadd.f32 1.0, %v3440_v7 }
0x27dd   :  { %v2518_v13 = vadd.f32 1.0, %v3442_v10 }
0x27de   :  { %3443 = vrcp.f32 %v2517_v11 }
0x27df   :  { %3445 = vrcp.f32 %v2518_v13 }
0x27e8   :  { %v3444_v9 = vpop.eup %3443 }
0x27e9   :  { %v3446_v0 = vpop.eup %3445  ;;  %v2525_v18 = vmul.f32 %v3444_v9, %v2386_v28 }
0x27ea   :  { %v2526_v22 = vmul.f32 %v3446_v0, %v2387_v32 }
0x284b   :  { %v2530_v1 = vpop.permute.xlu1 %2529 }
0x284c   :  { %v2535_v14 = vmul.f32 %v3444_v9, %v2530_v1 }
0x284d   :  { %v2532_v15 = vpop.permute.xlu0 %2531 }
0x284e   :  { %2539 = vrot.lane.b32.xlu1 %v2535_v14, %s3569_s2  ;;  %v2536_v12 = vmul.f32 %v3446_v0, %v2532_v15 }
0x2850   :  { %2541 = vrot.lane.b32.xlu0 %v2536_v12, %s3569_s2 }
0x28c0   :  { %v2540_v19 = vpop.permute.xlu1 %2539 }
0x28c1   :  { %v2545_v20 = vadd.f32 %v2540_v19, %v2525_v18 }
0x28c2   :  { %v2542_v21 = vpop.permute.xlu0 %2541 }
0x28c3   :  { %3447 = vtanh.f32 %v2545_v20  ;;  %v2546_v25 = vadd.f32 %v2542_v21, %v2526_v22 }
0x28c5   :  { %3449 = vtanh.f32 %v2546_v25 }
0x28cd   :  { %v3448_v24 = vpop.eup %3447 }
0x28ce   :  { %2551 = vrot.lane.b32.xlu1 %v3448_v24, %s3570_s3 }
0x28cf   :  { %v3450_v26 = vpop.eup %3449 }
0x28d0   :  { %2553 = vrot.lane.b32.xlu0 %v3450_v26, %s3570_s3 }
0x2940   :  { %v2552_v27 = vpop.permute.xlu1 %2551 }
0x2941   :  { %v2557_v33 = vmul.f32 %v3444_v9, %v2552_v27 }
0x2942   :  { %v2554_v29 = vpop.permute.xlu0 %2553 }
0x2943   :  { %v2558_v34 = vmul.f32 %v3446_v0, %v2554_v29  ;;  %v2567_v36 = vrot.slane %v2557_v33, %v3701_v63 }
0x2945   :  { %v2574_v35 = vrot.slane %v2558_v34, %v3701_v63  ;;  %v2588_v28 = vrot.slane %v2558_v34, 7 }
0x2947   :  { %v2577_v32 = vrot.slane %v2574_v35, 7  ;;  %v2589_v37 = vsel %vm350_vm4, %v2588_v28, %v2557_v33 }
0x2948   :  { %2590 = vrot.lane.b32.xlu0 %v2589_v37, %s3569_s2 }
0x2949   :  { %v2578_v39 = vsel %vm350_vm4, %v2577_v32, %v2567_v36 }
0x294a   :  { %v2579_v41 = vsel %vm352_vm5, %v2577_v32, %v2578_v39 }
0x294b   :  { %v2580_v43 = vsel %vm354_vm6, %v2577_v32, %v2579_v41 }
0x294c   :  { %v2581_v38 = vsel %vm356_vm7, %v2577_v32, %v2580_v43 }
0x29ba   :  { %v2591_v46 = vpop.permute.xlu0 %2590 }
0x29bb   :  { %3096 = vmatmul.mubr.msk.f32.vlgmr.msra.gmra.mrb[18].mxu0 %vm193_vm3, %v2591_v46 }
0x2a8e   :  { %v2660_v47 = vpop.f32.mrb[18].mxu0 }
0x2a8f   :  { %v2665_v49 = vrot.slane %v2660_v47, 1  ;;  %v2668_v50 = vadd.f32 %v2660_v47, %v2586_v42  ;;  %v3097_v54 = vpop.f32.mrb[19].mxu0 }
0x2a91   :  { %v2669_v56 = vadd.f32 %v2665_v49, %v2587_v45  ;;  %3451 = vtanh.f32 %v2668_v50  ;;  %v2824_v58 = vmul.f32 -1.442695, %v2668_v50 }
0x2a93   :  { %3453 = vtanh.f32 %v2669_v56  ;;  %v2825_v53 = vmul.f32 -1.442695, %v2669_v56 }
0x2a94   :  { %3455 = vpow2.f32 %v2824_v58 }
0x2a95   :  { %3457 = vpow2.f32 %v2825_v53 }
0x2a9b   :  { %v3452_v48 = vpop.eup %3451 }
0x2a9c   :  { %2688 = vrot.lane.b32.xlu0 %v3452_v48, %s3570_s3 }
0x2a9d   :  { %v3454_v57 = vpop.eup %3453 }
0x2a9e   :  { %2690 = vrot.lane.b32.xlu1 %v3454_v57, %s3570_s3  ;;  %v3456_v61 = vpop.eup %3455 }
0x2a9f   :  { %v3458_v62 = vpop.eup %3457  ;;  %v2676_v4 = vadd.f32 1.0, %v3456_v61 }
0x2aa0   :  { %v2677_v5 = vadd.f32 1.0, %v3458_v62 }
0x2aa1   :  { %3459 = vrcp.f32 %v2676_v4 }
0x2aa2   :  { %3461 = vrcp.f32 %v2677_v5 }
0x2aab   :  { %v3460_v60 = vpop.eup %3459 }
0x2aac   :  { %v3462_v10 = vpop.eup %3461  ;;  %v2684_v9 = vmul.f32 %v3460_v60, %v2545_v20 }
0x2aad   :  { %v2685_v0 = vmul.f32 %v3462_v10, %v2546_v25 }
0x2b0e   :  { %v2689_v3 = vpop.permute.xlu0 %2688 }
0x2b0f   :  { %v2694_v7 = vmul.f32 %v3460_v60, %v2689_v3 }
0x2b10   :  { %v2691_v11 = vpop.permute.xlu1 %2690 }
0x2b11   :  { %2698 = vrot.lane.b32.xlu0 %v2694_v7, %s3569_s2  ;;  %v2695_v13 = vmul.f32 %v3462_v10, %v2691_v11 }
0x2b13   :  { %2700 = vrot.lane.b32.xlu1 %v2695_v13, %s3569_s2 }
0x2b83   :  { %v2699_v1 = vpop.permute.xlu0 %2698 }
0x2b84   :  { %v2704_v14 = vadd.f32 %v2699_v1, %v2684_v9 }
0x2b85   :  { %v2701_v15 = vpop.permute.xlu1 %2700 }
0x2b86   :  { %3463 = vtanh.f32 %v2704_v14  ;;  %v2705_v12 = vadd.f32 %v2701_v15, %v2685_v0 }
0x2b88   :  { %3465 = vtanh.f32 %v2705_v12 }
0x2b90   :  { %v3464_v18 = vpop.eup %3463 }
0x2b91   :  { %2710 = vrot.lane.b32.xlu0 %v3464_v18, %s3570_s3 }
0x2b92   :  { %v3466_v19 = vpop.eup %3465 }
0x2b93   :  { %2712 = vrot.lane.b32.xlu1 %v3466_v19, %s3570_s3 }
0x2b95   :  { %996 = vrot.lane.b32.xlu0 %v3805_v17, %s3569_s2 }
0x2b97   :  { %358 = vrot.lane.b32.xlu1 %v3711_v16, %s3569_s2  ;;  %v2751_v16 = vrot.slane %v2705_v12, 7 }
0x2b99   :  { %2264 = vrot.lane.b32.xlu0 %v3988_v55, %s3569_s2  ;;  %v2752_v17 = vsel %vm350_vm4, %v2751_v16, %v2704_v14 }
0x2b9b   :  { %1630 = vrot.lane.b32.xlu1 %v3897_v31, %s3569_s2 }
0x2b9d   :  { %1155 = vrot.lane.b32.xlu0 %v3828_v2, %s3570_s3 }
0x2b9f   :  { %518 = vrot.lane.b32.xlu1 %v3736_v59, %s3570_s3 }
0x2ba1   :  { %2423 = vrot.lane.b32.xlu0 %v4010_v52, %s3570_s3 }
0x2ba3   :  { %1789 = vrot.lane.b32.xlu1 %v3920_v23, %s3570_s3 }
0x2ba5   :  { %1314 = vrot.lane.b32.xlu0 %v3851_v51, %s3572_s27 }
0x2ba7   :  { %678 = vrot.lane.b32.xlu1 %v3759_v44, %s3572_s27 }
0x2ba9   :  { %2582 = vrot.lane.b32.xlu0 %v2581_v38, %s3572_s27 }
0x2bab   :  { %1948 = vrot.lane.b32.xlu1 %v3943_v8, %s3572_s27 }
0x2bad   :  { %2753 = vrot.lane.b32.xlu0 %v2752_v17, %s3572_s27 }
0x2c03   :  { %v2711_v2 = vpop.permute.xlu0 %2710 }
0x2c04   :  { %v2716_v52 = vmul.f32 %v3460_v60, %v2711_v2 }
0x2c05   :  { %v2713_v59 = vpop.permute.xlu1 %2712 }
0x2c06   :  { %v2717_v31 = vmul.f32 %v3462_v10, %v2713_v59  ;;  %v2726_v24 = vrot.slane %v2716_v52, %v3701_v63 }
0x2c07   :  { %v997_v55 = vpop.permute.xlu0 %996 }
0x2c08   :  { %999 = vst.msk [vmem:[#allocation11 + $0x2] sm:$0x3] %vm63_vm1, %v997_v55  ;;  %v2743_v23 = vrot.slane %v2717_v31, 7  ;;  %v2733_v51 = vrot.slane %v2717_v31, %v3701_v63 }
0x2c09   :  { %v359_v20 = vpop.permute.xlu1 %358 }
0x2c0a   :  { %362 = vst.msk [vmem:[#allocation11] sm:$0x3] %vm63_vm1, %v359_v20  ;;  %v2744_v22 = vsel %vm350_vm4, %v2743_v23, %v2716_v52  ;;  %v2736_v21 = vrot.slane %v2733_v51, 7 }
0x2c0b   :  { %v2265_v44 = vpop.permute.xlu0 %2264  ;;  %2745 = vrot.lane.b32.xlu1 %v2744_v22, %s3569_s2 }
0x2c0c   :  { %2267 = vst.msk [vmem:[#allocation11 + $0x6] sm:$0x3] %vm63_vm1, %v2265_v44  ;;  %v2737_v27 = vsel %vm350_vm4, %v2736_v21, %v2726_v24 }
0x2c0d   :  { %v1631_v8 = vpop.permute.xlu1 %1630  ;;  %v2738_v33 = vsel %vm352_vm5, %v2736_v21, %v2737_v27 }
0x2c0e   :  { %1633 = vst.msk [vmem:[#allocation11 + $0x4] sm:$0x3] %vm63_vm1, %v1631_v8  ;;  %v2739_v63 = vsel %vm354_vm6, %v2736_v21, %v2738_v33 }
0x2c0f   :  { %v1156_v25 = vpop.permute.xlu0 %1155  ;;  %v2740_v32 = vsel %vm356_vm7, %v2736_v21, %v2739_v63 }
0x2c10   :  { %1158 = vst.msk [vmem:[#allocation11 + $0x2] sm:$0x3] %vm521_vm8, %v1156_v25 }
0x2c11   :  { %v519_v26 = vpop.permute.xlu1 %518 }
0x2c12   :  { %522 = vst.msk [vmem:[#allocation11] sm:$0x3] %vm521_vm8, %v519_v26 }
0x2c13   :  { %v2424_v29 = vpop.permute.xlu0 %2423 }
0x2c14   :  { %2426 = vst.msk [vmem:[#allocation11 + $0x6] sm:$0x3] %vm521_vm8, %v2424_v29 }
0x2c15   :  { %v1790_v34 = vpop.permute.xlu1 %1789 }
0x2c16   :  { %1792 = vst.msk [vmem:[#allocation11 + $0x4] sm:$0x3] %vm521_vm8, %v1790_v34 }
0x2c17   :  { %v1315_v35 = vpop.permute.xlu0 %1314 }
0x2c18   :  { %1317 = vst.msk [vmem:[#allocation11 + $0x2] sm:$0x3] %vm681_vm9, %v1315_v35 }
0x2c19   :  { %1474 = vst.msk [vmem:[#allocation11 + $0x2] sm:$0x3] %vm839_vm10, %v3874_v40  ;;  %v679_v28 = vpop.permute.xlu1 %678 }
0x2c1a   :  { %682 = vst.msk [vmem:[#allocation11] sm:$0x3] %vm681_vm9, %v679_v28 }
0x2c1b   :  { %v2583_v36 = vpop.permute.xlu0 %2582  ;;  %840 = vst.msk [vmem:[#allocation11] sm:$0x3] %vm839_vm10, %v3782_v30 }
0x2c1c   :  { %2585 = vst.msk [vmem:[#allocation11 + $0x6] sm:$0x3] %vm681_vm9, %v2583_v36 }
0x2c1d   :  { %2742 = vst.msk [vmem:[#allocation11 + $0x6] sm:$0x3] %vm839_vm10, %v2740_v32  ;;  %v1949_v37 = vpop.permute.xlu1 %1948 }
0x2c1e   :  { %1951 = vst.msk [vmem:[#allocation11 + $0x4] sm:$0x3] %vm681_vm9, %v1949_v37 }
0x2c1f   :  { %v2754_v40 = vpop.permute.xlu0 %2753  ;;  %2108 = vst.msk [vmem:[#allocation11 + $0x4] sm:$0x3] %vm839_vm10, %v3966_v6 }
0x2c20   :  { %2756 = vst.msk [vmem:[#allocation3] sm:$0x3] %vm63_vm1, %v2754_v40 }
0x2c21   :  { %3544 = shalt.err (!%p3541_p0)
}
0x2c22   :  { %s3545_s7 = scalar_lea.hbm %s4099_s4, 128 }
0x2c23   :  { %p3546_p1 = scmp.ne.s32.totalorder %s4099_s4, %s3545_s7  ;;  %p3549_p2 = scmp.lt.u32.totalorder %s3545_s7, %s4099_s4 }
0x2c25   :  { %p3551_p3 = pnand %p3549_p2, %p3546_p1 }
0x2c27   :  { %3554 = shalt.err (!%p3551_p3)
}
0x2c28   :  { %2766 = dma.vmem_to_hbm [thread:$0]  %s2764_s29, 128, %s4099_s4, [#allocation7]  }
0x2c7d   :  { %v2746_v30 = vpop.permute.xlu1 %2745 }
0x2c7e   :  { %2748 = vst.msk [vmem:[#allocation2] sm:$0x3] %vm63_vm1, %v2746_v30 }
0x2c7f   :  { %3559 = dma.done.wait [#allocation7], 128  }
0x2c80   :  { %3560 = vsyncadd [#allocation7], 4294967168 }
0x2c81   :  { %2770 = vsyncpa [#allocation6], 1 }
0x2c82   :  { %2771 = vsyncpa [#allocation9], 1 }
0x2c83   :  { %2772 = vsyncpa [#allocation7], 1 }

</bundles_post_ra>
